<compile_context>
chip_gen: v6e
topology: v6e:2x2x1
jax: 0.10.0
libtpu: 0.0.40
codegen_flags: <defaults>
</compile_context>

<pallas_src>
import numpy as np
import jax
import jax.numpy as jnp
from jax.experimental import pallas as pl
from jax.experimental.pallas import tpu as pltpu


def psroi_pool(features, rois, *, pooled_height, pooled_width, spatial_scale,
               group_size, output_dim, rois_per_tile=8,
               feature_dtype=jnp.float32):
    N, C, H, W = (int(d) for d in features.shape)
    R = int(rois.shape[0])
    K, G = int(output_dim), int(group_size)
    G2, HW, KG2 = G * G, H * W, K * G * G
    assert pooled_height == pooled_width == G, (
        "This kernel (like the reference CUDA op) assumes "
        "group_size == pooled_height == pooled_width")
    assert C == KG2, "channels must equal output_dim * group_size**2"

    scale = float(spatial_scale)
    Hf, Wf = float(H), float(W)

    # ---------------- host-side layout + tiny per-ROI precompute ----------------
    # Lane-dense feature layout: (N, G2, K, H*W).  Channel c = k*G2 + g2 with
    # g2 = gi*G + gj, so reshape (N, K, G2, H, W) then move g2 in front of K.
    # (feature_dtype=jnp.bfloat16 halves the dominant HBM transfer at some
    #  accuracy cost; default f32 keeps bit-level parity with the CUDA op.)
    feat = features.reshape(N, K, G2, H, W).transpose(0, 2, 1, 3, 4)
    feat = feat.reshape(N, G2, K, HW).astype(feature_dtype)

    r32 = rois.astype(jnp.float32)
    x1 = jnp.floor(r32[:, 1] + 0.5) * scale        # round-half-up == C round()
    y1 = jnp.floor(r32[:, 2] + 0.5) * scale        # (valid for coords >= 0)
    x2 = (jnp.floor(r32[:, 3] + 0.5) + 1.0) * scale
    y2 = (jnp.floor(r32[:, 4] + 0.5) + 1.0) * scale
    roi_w = jnp.maximum(x2 - x1, 0.1)
    roi_h = jnp.maximum(y2 - y1, 0.1)
    bin_w = roi_w / float(pooled_width)
    bin_h = roi_h / float(pooled_height)
    bidx = jnp.floor(r32[:, 0] + 0.5)              # half-up parity with round()

    # Per-ROI, per-bin boundaries (R, G), clipped exactly like the CUDA kernel.
    p = jnp.arange(G, dtype=jnp.float32)[None, :]
    hs = jnp.clip(jnp.floor(p * bin_h[:, None] + y1[:, None]), 0.0, Hf)
    he = jnp.clip(jnp.ceil((p + 1.0) * bin_h[:, None] + y1[:, None]), 0.0, Hf)
    ws = jnp.clip(jnp.floor(p * bin_w[:, None] + x1[:, None]), 0.0, Wf)
    we = jnp.clip(jnp.ceil((p + 1.0) * bin_w[:, None] + x1[:, None]), 0.0, Wf)

    # ROI tiling: B_R rois per grid step (multiple of 8 sublanes), pad to RP.
    B_R = max(8, (int(rois_per_tile) // 8) * 8)
    T = -(-R // B_R)
    RP = T * B_R

    def pad_rows(x, fill=0.0):
        if RP == R:
            return x
        padshape = (RP - R,) + x.shape[1:]
        return jnp.concatenate([x, jnp.full(padshape, fill, x.dtype)], axis=0)

    hs_p, he_p = pad_rows(hs), pad_rows(he)
    ws_p, we_p = pad_rows(ws), pad_rows(we)
    bidx_g = jnp.broadcast_to(pad_rows(bidx[:, None], fill=-1.0), (RP, G))

    # Packed params: (T, 5, G, B_R, 1) rows = [hstart, hend, wstart, wend, bidx]
    params = jnp.stack([hs_p, he_p, ws_p, we_p, bidx_g], axis=0)     # (5, RP, G)
    params = params.reshape(5, T, B_R, G).transpose(1, 0, 3, 2)[..., None]

    # Flattened spatial coordinates (h(s), w(s)) for s = h*W + w, lane axis = HW.
    s_idx = jnp.arange(HW, dtype=jnp.int32)
    coords = jnp.stack([(s_idx // W).astype(jnp.float32),
                        (s_idx % W).astype(jnp.float32)], axis=0).reshape(2, 1, HW)

    # ------------------------------- kernel -------------------------------------
    def kernel(params_ref, coords_ref, feat_ref, out_ref):
        pr = params_ref[0]                            # (5, G, B_R, 1)
        hs_k, he_k = pr[0], pr[1]                     # (G, B_R, 1)
        ws_k, we_k = pr[2], pr[3]
        bsel = pr[4, 0:1]                             # (1, B_R, 1)

        c = coords_ref[...]                           # (2, 1, HW)
        hcoord, wcoord = c[0:1], c[1:2]               # (1, 1, HW)

        # Membership masks, vectorized over all B_R ROIs (sublanes) x HW (lanes).
        in_h = (hcoord >= hs_k) & (hcoord < he_k)     # (G, B_R, HW)
        in_w = (wcoord >= ws_k) & (wcoord < we_k)     # (G, B_R, HW)
        mask = (in_h[:, None] & in_w[None]).astype(jnp.float32)   # (G, G, B_R, HW)
        mask = mask.reshape(G2, B_R, HW)

        feat_b = feat_ref[0]                          # (G2, K, HW), resident per n

        # Position-sensitive pooled sums on the MXU: batch = g2, contract HW.
        pooled = jnp.einsum(
            "gbs,gks->gbk", mask, feat_b,
            preferred_element_type=jnp.float32,
            precision=jax.lax.Precision.HIGHEST)      # (G2, B_R, K)

        dh = he_k - hs_k                              # (G, B_R, 1)
        dw = we_k - ws_k
        area = (dh[:, None] * dw[None]).reshape(G2, B_R, 1)
        nonempty = ((dh > 0.0)[:, None] & (dw > 0.0)[None]).reshape(G2, B_R, 1)
        inv_area = jnp.where(nonempty, 1.0 / jnp.where(nonempty, area, 1.0), 0.0)

        # Only ROIs belonging to this grid step's batch element contribute.
        n_f = pl.program_id(0).astype(jnp.float32)
        sel = (bsel == n_f).astype(jnp.float32)       # (1, B_R, 1)

        out3 = pooled * (inv_area * sel)              # (G2, B_R, K)
        # Lane-dense store: (B_R, G2*K); channel order g2*K + k is undone on host.
        out_ref[...] = jnp.transpose(out3, (1, 0, 2)).reshape(1, B_R, G2 * K)

    # ---------------------------- pallas_call ------------------------------------
    feat_block_bytes = G2 * K * HW * np.dtype(feature_dtype).itemsize
    mask_bytes = G2 * B_R * HW * 4
    out_block_bytes = B_R * KG2 * 4
    vmem_limit = int(min(
        110 * 1024 * 1024,
        max(32 * 1024 * 1024,
            2 * feat_block_bytes + 2 * mask_bytes + 8 * out_block_bytes
            + (4 << 20))))

    out_nt = pl.pallas_call(
        kernel,
        out_shape=jax.ShapeDtypeStruct((N, RP, KG2), jnp.float32),
        grid=(N, T),   # t innermost -> feature block re-DMA'd only when n changes
        in_specs=[
            pl.BlockSpec((1, 5, G, B_R, 1), lambda n, t: (t, 0, 0, 0, 0)),
            pl.BlockSpec((2, 1, HW), lambda n, t: (0, 0, 0)),
            pl.BlockSpec((1, G2, K, HW), lambda n, t: (n, 0, 0, 0)),
        ],
        out_specs=pl.BlockSpec((1, B_R, KG2), lambda n, t: (n, t, 0)),
        compiler_params=pltpu.CompilerParams(
            dimension_semantics=("parallel", "parallel"),
            vmem_limit_bytes=vmem_limit),
    )(params, coords, feat)

    # Each ROI matches exactly one n (non-matching contributions are exactly 0).
    out = out_nt.sum(axis=0)[:R]                      # (R, G2*K), channel = g2*K+k
    out = out.reshape(R, G2, K).transpose(0, 2, 1).reshape(R, K, G, G)
    return out


class PSRoIPool:
    """JAX/Pallas equivalent of the PyTorch PSRoIPool module (forward only)."""

    def __init__(self, pooled_height, pooled_width, spatial_scale, group_size,
                 output_dim):
        self.pooled_height = int(pooled_height)
        self.pooled_width = int(pooled_width)
        self.spatial_scale = float(spatial_scale)
        self.group_size = int(group_size)
        self.output_dim = int(output_dim)

    def __call__(self, features, rois):
        return psroi_pool(
            features, rois,
            pooled_height=self.pooled_height,
            pooled_width=self.pooled_width,
            spatial_scale=self.spatial_scale,
            group_size=self.group_size,
            output_dim=self.output_dim,
        )


def psroi_ref_np(features, rois, pooled_h, pooled_w, spatial_scale, group_size,
                 output_dim):
    """Scalar numpy reference mirroring the CUDA kernel (float32 arithmetic)."""
    feats = np.asarray(features, np.float32)
    r = np.asarray(rois, np.float32)
    _, _, H, W = feats.shape
    R = r.shape[0]
    scale = np.float32(spatial_scale)
    out = np.zeros((R, output_dim, pooled_h, pooled_w), np.float32)
    for n in range(R):
        bi = int(round(float(r[n, 0])))
        rsw = np.float32(np.floor(r[n, 1] + np.float32(0.5))) * scale
        rsh = np.float32(np.floor(r[n, 2] + np.float32(0.5))) * scale
        rew = np.float32(np.floor(r[n, 3] + np.float32(0.5)) + np.float32(1.0)) * scale
        reh = np.float32(np.floor(r[n, 4] + np.float32(0.5)) + np.float32(1.0)) * scale
        roi_w = np.maximum(rew - rsw, np.float32(0.1))
        roi_h = np.maximum(reh - rsh, np.float32(0.1))
        bin_h = roi_h / np.float32(pooled_h)
        bin_w = roi_w / np.float32(pooled_w)
        for ct in range(output_dim):
            for i in range(pooled_h):
                for j in range(pooled_w):
                    hs = int(np.floor(np.float32(i) * bin_h + rsh))
                    he = int(np.ceil(np.float32(i + 1) * bin_h + rsh))
                    ws = int(np.floor(np.float32(j) * bin_w + rsw))
                    we = int(np.ceil(np.float32(j + 1) * bin_w + rsw))
                    hs = min(max(hs, 0), H); he = min(max(he, 0), H)
                    ws = min(max(ws, 0), W); we = min(max(we, 0), W)
                    empty = (he <= hs) or (we <= ws)
                    c = (ct * group_size + i) * group_size + j
                    if empty:
                        out[n, ct, i, j] = 0.0
                    else:
                        s = feats[bi, c, hs:he, ws:we].sum(dtype=np.float32)
                        out[n, ct, i, j] = s / np.float32((he - hs) * (we - ws))
    return out


if __name__ == "__main__":
    key = jax.random.PRNGKey(0)
    kf, kb, kx, ky, kw, kh = jax.random.split(key, 6)

    N, K, G = 2, 4, 3             # batch, output_dim, group_size (= pooled size)
    H = W = 16                    # feature map spatial dims
    spatial_scale = 0.25          # input image is 64x64
    C = K * G * G                 # 36 channels
    R = 5                         # number of rois

    features = jax.random.normal(kf, (N, C, H, W), dtype=jnp.float32)

    b = jax.random.randint(kb, (R,), 0, N)
    x1 = jax.random.randint(kx, (R,), 0, 40)
    y1 = jax.random.randint(ky, (R,), 0, 40)
    bw = jax.random.randint(kw, (R,), 4, 24)
    bh = jax.random.randint(kh, (R,), 4, 24)
    x2 = jnp.clip(x1 + bw, 0, 63)
    y2 = jnp.clip(y1 + bh, 0, 63)
    rois = jnp.stack([b, x1, y1, x2, y2], axis=1).astype(jnp.float32)

    pool = PSRoIPool(G, G, spatial_scale, G, K)
    out = jax.block_until_ready(pool(features, rois))

    ref = psroi_ref_np(features, rois, G, G, spatial_scale, G, K)
    np.testing.assert_allclose(np.asarray(out), ref, rtol=1e-4, atol=1e-4)
    print("KERNEL_OK")
</pallas_src>

<mosaic_0001>
module attributes {stable_mosaic.version = 11 : i64} {
  func.func @kernel(%arg0: i32, %arg1: i32, %arg2: memref<1x5x3x8x1xf32, #tpu.memory_space<vmem>>, %arg3: memref<2x1x256xf32, #tpu.memory_space<vmem>>, %arg4: memref<1x9x4x256xf32, #tpu.memory_space<vmem>>, %arg5: memref<1x8x36xf32, #tpu.memory_space<vmem>>) attributes {dimension_semantics = [#tpu.dimension_semantics<parallel>, #tpu.dimension_semantics<parallel>], iteration_bounds = array<i64: 2, 1>, scalar_prefetch = 0 : i64, scratch_operands = 0 : i64, tpu.core_type = #tpu.core_type<tc>, window_params = [{transform_indices = @transform_0, window_bounds = array<i64: 1, 5, 3, 8, 1>}, {pipeline_mode = #tpu.pipeline_mode<synchronous>, transform_indices = @transform_1, window_bounds = array<i64: 2, 1, 256>}, {transform_indices = @transform_2, window_bounds = array<i64: 1, 9, 4, 256>}, {transform_indices = @transform_3, window_bounds = array<i64: 1, 8, 36>}]} {
    %c0 = arith.constant 0 : index
    %c0_0 = arith.constant 0 : index
    %c0_1 = arith.constant 0 : index
    %c0_2 = arith.constant 0 : index
    %c0_3 = arith.constant 0 : index
    %0 = vector.load %arg2[%c0, %c0_0, %c0_1, %c0_2, %c0_3] : memref<1x5x3x8x1xf32, #tpu.memory_space<vmem>>, vector<1x5x3x8x1xf32>
    %1 = vector.shape_cast %0 : vector<1x5x3x8x1xf32> to vector<5x3x8x1xf32>
    %2 = vector.extract_strided_slice %1 {offsets = [0, 0, 0, 0], sizes = [1, 3, 8, 1], strides = [1, 1, 1, 1]} : vector<5x3x8x1xf32> to vector<1x3x8x1xf32>
    %3 = vector.shape_cast %2 : vector<1x3x8x1xf32> to vector<3x8x1xf32>
    %4 = vector.extract_strided_slice %1 {offsets = [1, 0, 0, 0], sizes = [1, 3, 8, 1], strides = [1, 1, 1, 1]} : vector<5x3x8x1xf32> to vector<1x3x8x1xf32>
    %5 = vector.shape_cast %4 : vector<1x3x8x1xf32> to vector<3x8x1xf32>
    %6 = vector.extract_strided_slice %1 {offsets = [2, 0, 0, 0], sizes = [1, 3, 8, 1], strides = [1, 1, 1, 1]} : vector<5x3x8x1xf32> to vector<1x3x8x1xf32>
    %7 = vector.shape_cast %6 : vector<1x3x8x1xf32> to vector<3x8x1xf32>
    %8 = vector.extract_strided_slice %1 {offsets = [3, 0, 0, 0], sizes = [1, 3, 8, 1], strides = [1, 1, 1, 1]} : vector<5x3x8x1xf32> to vector<1x3x8x1xf32>
    %9 = vector.shape_cast %8 : vector<1x3x8x1xf32> to vector<3x8x1xf32>
    %10 = vector.extract_strided_slice %1 {offsets = [4, 0, 0, 0], sizes = [1, 1, 8, 1], strides = [1, 1, 1, 1]} : vector<5x3x8x1xf32> to vector<1x1x8x1xf32>
    %11 = vector.shape_cast %10 : vector<1x1x8x1xf32> to vector<1x8x1xf32>
    %c0_4 = arith.constant 0 : index
    %c0_5 = arith.constant 0 : index
    %c0_6 = arith.constant 0 : index
    %12 = vector.load %arg3[%c0_4, %c0_5, %c0_6] : memref<2x1x256xf32, #tpu.memory_space<vmem>>, vector<2x1x256xf32>
    %13 = vector.extract_strided_slice %12 {offsets = [0, 0, 0], sizes = [1, 1, 256], strides = [1, 1, 1]} : vector<2x1x256xf32> to vector<1x1x256xf32>
    %14 = vector.extract_strided_slice %12 {offsets = [1, 0, 0], sizes = [1, 1, 256], strides = [1, 1, 1]} : vector<2x1x256xf32> to vector<1x1x256xf32>
    %15 = vector.broadcast %13 : vector<1x1x256xf32> to vector<3x8x256xf32>
    %16 = vector.broadcast %3 : vector<3x8x1xf32> to vector<3x8x256xf32>
    %17 = arith.cmpf oge, %15, %16 : vector<3x8x256xf32>
    %18 = vector.broadcast %13 : vector<1x1x256xf32> to vector<3x8x256xf32>
    %19 = vector.broadcast %5 : vector<3x8x1xf32> to vector<3x8x256xf32>
    %20 = arith.cmpf olt, %18, %19 : vector<3x8x256xf32>
    %21 = arith.andi %17, %20 : vector<3x8x256xi1>
    %22 = vector.broadcast %14 : vector<1x1x256xf32> to vector<3x8x256xf32>
    %23 = vector.broadcast %7 : vector<3x8x1xf32> to vector<3x8x256xf32>
    %24 = arith.cmpf oge, %22, %23 : vector<3x8x256xf32>
    %25 = vector.broadcast %14 : vector<1x1x256xf32> to vector<3x8x256xf32>
    %26 = vector.broadcast %9 : vector<3x8x1xf32> to vector<3x8x256xf32>
    %27 = arith.cmpf olt, %25, %26 : vector<3x8x256xf32>
    %28 = arith.andi %24, %27 : vector<3x8x256xi1>
    %29 = vector.shape_cast %21 : vector<3x8x256xi1> to vector<3x1x8x256xi1>
    %30 = vector.shape_cast %28 : vector<3x8x256xi1> to vector<1x3x8x256xi1>
    %31 = vector.broadcast %29 : vector<3x1x8x256xi1> to vector<3x3x8x256xi1>
    %32 = vector.broadcast %30 : vector<1x3x8x256xi1> to vector<3x3x8x256xi1>
    %33 = arith.andi %31, %32 : vector<3x3x8x256xi1>
    %34 = arith.extui %33 : vector<3x3x8x256xi1> to vector<3x3x8x256xi32>
    %35 = arith.sitofp %34 : vector<3x3x8x256xi32> to vector<3x3x8x256xf32>
    %36 = vector.shape_cast %35 : vector<3x3x8x256xf32> to vector<9x8x256xf32>
    %c0_7 = arith.constant 0 : index
    %c0_8 = arith.constant 0 : index
    %c0_9 = arith.constant 0 : index
    %c0_10 = arith.constant 0 : index
    %37 = vector.load %arg4[%c0_7, %c0_8, %c0_9, %c0_10] : memref<1x9x4x256xf32, #tpu.memory_space<vmem>>, vector<1x9x4x256xf32>
    %38 = vector.shape_cast %37 : vector<1x9x4x256xf32> to vector<9x4x256xf32>
    "tpu.trace_start"() <{level = 10 : i32, message = "gbs,gks->gbk"}> : () -> ()
    %cst = arith.constant dense<0.000000e+00> : vector<9x8x4xf32>
    %39 = tpu.matmul %36, %38, %cst {dimension_numbers = #tpu.dot_dimension_numbers<[2], [2], [1], [1], [0, 0, 0, 1, 1, 1], [0], [0]>, precision = #tpu.contract_precision<fp32>} : vector<9x8x256xf32>, vector<9x4x256xf32>, vector<9x8x4xf32> -> vector<9x8x4xf32>
    "tpu.trace_stop"() : () -> ()
    %40 = arith.subf %5, %3 : vector<3x8x1xf32>
    %41 = arith.subf %9, %7 : vector<3x8x1xf32>
    %42 = vector.shape_cast %40 : vector<3x8x1xf32> to vector<3x1x8x1xf32>
    %43 = vector.shape_cast %41 : vector<3x8x1xf32> to vector<1x3x8x1xf32>
    %44 = vector.broadcast %42 : vector<3x1x8x1xf32> to vector<3x3x8x1xf32>
    %45 = vector.broadcast %43 : vector<1x3x8x1xf32> to vector<3x3x8x1xf32>
    %46 = arith.mulf %44, %45 : vector<3x3x8x1xf32>
    %47 = vector.shape_cast %46 : vector<3x3x8x1xf32> to vector<9x8x1xf32>
    %cst_11 = arith.constant 0.000000e+00 : f32
    %48 = vector.broadcast %cst_11 : f32 to vector<3x8x1xf32>
    %49 = arith.cmpf ogt, %40, %48 : vector<3x8x1xf32>
    %50 = vector.shape_cast %49 : vector<3x8x1xi1> to vector<3x1x8x1xi1>
    %cst_12 = arith.constant 0.000000e+00 : f32
    %51 = vector.broadcast %cst_12 : f32 to vector<3x8x1xf32>
    %52 = arith.cmpf ogt, %41, %51 : vector<3x8x1xf32>
    %53 = vector.shape_cast %52 : vector<3x8x1xi1> to vector<1x3x8x1xi1>
    %54 = vector.broadcast %50 : vector<3x1x8x1xi1> to vector<3x3x8x1xi1>
    %55 = vector.broadcast %53 : vector<1x3x8x1xi1> to vector<3x3x8x1xi1>
    %56 = arith.andi %54, %55 : vector<3x3x8x1xi1>
    %57 = vector.shape_cast %56 : vector<3x3x8x1xi1> to vector<9x8x1xi1>
    %cst_13 = arith.constant 1.000000e+00 : f32
    %58 = vector.broadcast %cst_13 : f32 to vector<9x8x1xf32>
    %59 = arith.select %57, %47, %58 : vector<9x8x1xi1>, vector<9x8x1xf32>
    %cst_14 = arith.constant 1.000000e+00 : f32
    %60 = vector.broadcast %cst_14 : f32 to vector<9x8x1xf32>
    %61 = arith.divf %60, %59 : vector<9x8x1xf32>
    %cst_15 = arith.constant 0.000000e+00 : f32
    %62 = vector.broadcast %cst_15 : f32 to vector<9x8x1xf32>
    %63 = arith.select %57, %61, %62 : vector<9x8x1xi1>, vector<9x8x1xf32>
    %64 = arith.sitofp %arg0 : i32 to f32
    %65 = vector.broadcast %64 : f32 to vector<1x8x1xf32>
    %66 = arith.cmpf oeq, %11, %65 : vector<1x8x1xf32>
    %67 = arith.extui %66 : vector<1x8x1xi1> to vector<1x8x1xi32>
    %68 = arith.sitofp %67 : vector<1x8x1xi32> to vector<1x8x1xf32>
    %69 = vector.broadcast %68 : vector<1x8x1xf32> to vector<9x8x1xf32>
    %70 = arith.mulf %63, %69 : vector<9x8x1xf32>
    %71 = vector.broadcast %70 : vector<9x8x1xf32> to vector<9x8x4xf32>
    %72 = arith.mulf %39, %71 : vector<9x8x4xf32>
    %73 = tpu.transpose %72, [1, 0, 2] : vector<9x8x4xf32> -> vector<8x9x4xf32>
    %74 = vector.shape_cast %73 : vector<8x9x4xf32> to vector<1x8x36xf32>
    %c0_16 = arith.constant 0 : index
    %c0_17 = arith.constant 0 : index
    %c0_18 = arith.constant 0 : index
    %75 = vector.load %arg5[%c0_16, %c0_17, %c0_18] : memref<1x8x36xf32, #tpu.memory_space<vmem>>, vector<1x8x36xf32>
    tpu.vector_store %arg5[%c0_16, %c0_17, %c0_18], %74 {strides = array<i32>} : memref<1x8x36xf32, #tpu.memory_space<vmem>>, vector<1x8x36xf32>,
    return
  }
  func.func @transform_0(%arg0: i32, %arg1: i32) -> (i32, i32, i32, i32, i32) {
    %c0_i32 = arith.constant 0 : i32
    %c0_i32_0 = arith.constant 0 : i32
    %c0_i32_1 = arith.constant 0 : i32
    %c0_i32_2 = arith.constant 0 : i32
    %c0_i32_3 = arith.constant 0 : i32
    return %arg1, %c0_i32, %c0_i32_0, %c0_i32_1, %c0_i32_2 : i32, i32, i32, i32, i32
  }
  func.func @transform_1(%arg0: i32, %arg1: i32) -> (i32, i32, i32) {
    %c0_i32 = arith.constant 0 : i32
    %c0_i32_0 = arith.constant 0 : i32
    %c0_i32_1 = arith.constant 0 : i32
    %c0_i32_2 = arith.constant 0 : i32
    return %c0_i32, %c0_i32_0, %c0_i32_1 : i32, i32, i32
  }
  func.func @transform_2(%arg0: i32, %arg1: i32) -> (i32, i32, i32, i32) {
    %c0_i32 = arith.constant 0 : i32
    %c0_i32_0 = arith.constant 0 : i32
    %c0_i32_1 = arith.constant 0 : i32
    %c0_i32_2 = arith.constant 0 : i32
    return %arg0, %c0_i32, %c0_i32_0, %c0_i32_1 : i32, i32, i32, i32
  }
  func.func @transform_3(%arg0: i32, %arg1: i32) -> (i32, i32, i32) {
    %c0_i32 = arith.constant 0 : i32
    %c0_i32_0 = arith.constant 0 : i32
    return %arg0, %arg1, %c0_i32 : i32, i32, i32
  }
}

</mosaic_0001>

<bundles_post_ra>
// kernel: tpu_custom_call.1
= control target key start
LH: loop header
LB: loop body
LE: loop exit
PB: predicated region body
PF: predicated region fallthrough
CT: control target
= control target key end

     0   :  { %8 = vsyncpa [#allocation3], 0  ;;  %s6928_s0 = inlined_call_operand.vmem [shape: f32[1,5,3,8,1], index: 0, kind: input, shape index: {}]   ;;  %s6929_s1 = inlined_call_operand.vmem [shape: f32[2,1,256], index: 1, kind: input, shape index: {}]   ;;  %s6930_s2 = inlined_call_operand.hbm [shape: f32[2,9,4,256], index: 2, kind: input, shape index: {}]   ;;  %s6931_s3 = inlined_call_operand.hbm [shape: f32[2,8,36], index: 3, kind: output, shape index: {}]  }
   0x1   :  { %10 = vsyncpa [#allocation3 + $0x1], 0 }
   0x2   :  { %11 = vsyncpa [#allocation4], 0 }
   0x3   :  { %13 = vsyncpa [#allocation4 + $0x1], 0  ;;  %s5744_s12 = smov 0   ;;  %s5746_s13 = smov 0  }
   0x4   :  { %s5748_s14 = smov 0   ;;  %s5750_s15 = smov 0  }
   0x5   :  { %s5752_s16 = smov 0   ;;  %s5754_s17 = smov 0  }
   0x6 LB: > { %s5393_s18 = sadd.s32 4294967295, %s5705_s17   ;;  %s5394_s19 = sadd.s32 4294967294, %s5705_s17   ;;  %s5705_s17 = sphi %s5754_s17, %s19_s17   ;;  %s5701_s16 = sphi %s5752_s16, %s7036_s16   ;;  %s5697_s15 = sphi %s5750_s15, %s7035_s15   ;;  %s5693_s14 = sphi %s5748_s14, %s7034_s14   ;;  %s5689_s13 = sphi %s5746_s13, %s7033_s13   ;;  %s5685_s12 = sphi %s5744_s12, %s7032_s12  }
   0x7   : > { %s31_s20 = sadd.s32 1, %s5701_s16  ;;  %s85_s21 = sadd.s32 1, %s5693_s14 }
   0x8   : > { %p33_p0 = scmp.ge.s32.totalorder %s31_s20, 2  ;;  %p92_p1 = scmp.ne.s32.totalorder %s5693_s14, %s5689_s13 }
   0x9   : > { %p93_p2 = scmp.eq.s32.totalorder %s5705_s17, 0  ;;  %p98_p3 = scmp.ne.s32.totalorder %s5689_s13, %s5685_s12 }
   0xa   : > { %s7038_s20 = smov (%p33_p0, %s31_s20), 0  ;;  %p99_p5 = scmp.eq.s32.totalorder %s5393_s18, 0 }
   0xb   : > { %p5785_p4 = por %p93_p2, %p92_p1  ;;  %s82_s23 = ssub.s32 %s5701_s16, %s7038_s20 }
   0xc   : > { %p124_p6 = scmp.eq.s32.totalorder %s5393_s18, 1  ;;  %p83_p7 = scmp.eq.s32.totalorder %s82_s23, 0 }
   0xd   : > { %p5791_p8 = por %p99_p5, %p98_p3  ;;  %p130_p10 = scmp.eq.s32.totalorder %s5394_s19, 1 }
   0xe   : > { %p5795_p9 = por %p124_p6, %p92_p1  ;;  %p5503_p13 = scmp.lt.s32.totalorder %s5705_s17, 2 }
   0xf   : > { %s5800_s26 = scalar_select %p83_p7, %s5693_s14, %s85_s21  }
  0x10   : > { %p5802_p11 = por %p130_p10, %p98_p3  ;;  %s161_s28 = sand.u32 1, %s5693_s14  }
  0x11   : > { %s5488_s29 = smul.u32 72, %s161_s28  ;;  %p5812_p0 = pnand %p5503_p13, %p5785_p4 }
  0x12   : > { %s5489_s30 = smul.u32 1152, %s5701_s16  ;;  %p5399_p1 = scmp.ge.s32.totalorder %s5705_s17, 1 }
  0x13   : > { %s165_s8 = scalar_lea.vmem [#allocation2], %s5488_s29  ;;  %s162_s10 = scalar_lea.sflag [#allocation3], %s161_s28 }
  0x14   : > { %s171_s7 = scalar_lea.hbm %s6930_s2, %s5489_s30  ;;  %s172_s9 = sshll.u32 %s165_s8, 4  ;;  %s173_s9 = int_to_ptr.vmem [resolvable:$true] %s172_s9 }
  0x15   : > { %p5599_p2 = pneg %p5812_p0  ;;  %s5610_s11 = scalar_lea.vmem %s173_s9, 1152 }
  0x16   : > { %p5611_p3 = scmp.ne.s32.totalorder %s173_s9, %s5610_s11  ;;  %s5707_s18 = smov [#allocation2]  }
  0x17   : > { %s5615_s19 = sshll.u32 %s5707_s18, 4  ;;  %s5616_s19 = int_to_ptr.vmem [resolvable:$false] %s5615_s19 }
  0x18   : > { %p5613_p5 = pnand %p5611_p3, %p5599_p2  ;;  %s5617_s21 = scalar_lea.vmem %s5616_s19, 2304 }
  0x19   : > { %p5618_p4 = scmp.lt.s32.totalorder %s173_s9, %s5616_s19  ;;  %p5619_p7 = scmp.lt.s32.totalorder %s5617_s21, %s5610_s11 }
  0x1a   : > { %p5614_p6 = pneg %p5613_p5 }
  0x1b   : > { %p5620_p10 = por %p5619_p7, %p5618_p4 }
  0x1d   : > { %p5621_p13 = pnand %p5620_p10, %p5614_p6 }
  0x1f   : > { %5624 = shalt.err (!%p5621_p13)
}
  0x20   : > { %s5708_s22 = smov 128   ;;  %s5709_s23 = smov 8  }
  0x21   : > { %5498 = dma.hbm_to_vmem [thread:$0]  (!%p5812_p0), %s171_s7, 1152, %s173_s9, %s162_s10, %s5708_s22, %s5708_s22, %s5709_s23  }
  0x22   : > { %p180_p12 = scmp.lt.s32.totalorder %s5705_s17, 3 }
  0x24   : > { %p181_p2 = pnand %p5399_p1, %p180_p12 }
  0x25   : > { %s5828_s28 = sand.u32 (!%p181_p2), 1, %s5689_s13  }
  0x26   : > { %184 = sbr.rel (%p181_p2) target bundleno = 642 (0x282), region = 32  ;;  %s187_s30 = scalar_lea.sflag (!%p181_p2), [#allocation3], %s5828_s28 }
  0x27   : > { %s5490_s29 = smul.u32 (!%p181_p2), 72, %s5828_s28 }
  0x29   : > { %s5832_s5 = scalar_lea.vmem (!%p181_p2), [#allocation2], %s5490_s29 }
  0x2b   : > { %5676 = dma.done.wait (%p5791_p8), %s187_s30, 1152  }
  0x2c   : > { %5678 = vsyncadd (%p5791_p8), %s187_s30, 4294966144  ;;  %v5710_v0 = vmov 0   ;;  %v229_v1 = vld [vmem:[%s6928_s0 + $0x30] sm:$0xff]  ;;  %v232_v2 = vld [vmem:[%s6928_s0 + $0x48] sm:$0xff]  ;;  %s4796_s19 = scvt.s32.f32 %s5697_s15  ;;  %v5711_v57 = vmov 0.0   ;;  %s5716_s6 = smov 4  }
  0x2d   : > { %5569 = vset.pattern.permute.xlu1 %v5710_v0  ;;  %5568 = vset.pattern.permute.xlu0 %v5710_v0  ;;  %v223_v3 = vld [vmem:[%s6928_s0] sm:$0xff]  ;;  %v4721_v4 = vsub.f32 %v232_v2, %v229_v1  ;;  %v226_v5 = vld [vmem:[%s6928_s0 + $0x18] sm:$0xff]  ;;  %v233_v6 = vld [vmem:[%s6928_s0 + $0x50] sm:$0xff]  ;;  %s5717_s7 = smov 12   ;;  %s5718_s8 = smov 20  }
  0x2e   : > { %310 = vperm.xlu1 %5569, %v229_v1   ;;  %251 = vperm.xlu0 %5568, %v223_v3   ;;  %v230_v7 = vld [vmem:[%s6928_s0 + $0x38] sm:$0xff]  ;;  %v4718_v8 = vsub.f32 %v226_v5, %v223_v3  ;;  %v231_v11 = vld [vmem:[%s6928_s0 + $0x40] sm:$0xff]  ;;  %v5870_v14 = vld [vmem:[%s6928_s0 + $0x8] sm:$0xff]  ;;  %v4797_v49 = vstv %s4796_s19  ;;  %s5719_s9 = smov 16   ;;  %s5720_s10 = smov 28  }
  0x2f   : > { %v4722_v9 = vsub.f32 %v233_v6, %v230_v7  ;;  %v234_v10 = vld [vmem:[%s6928_s0 + $0x58] sm:$0xff]  ;;  %v5865_v12 = vld [vmem:[%s6928_s0 + $0x20] sm:$0xff]  ;;  %v5875_v15 = vld [vmem:[%s6928_s0 + $0x28] sm:$0xff]  ;;  %vm4736_vm0 = vcmp.gt.f32.partialorder %v4721_v4, 0.0  ;;  %s5721_s11 = smov 24   ;;  %s5722_s24 = smov 32  }
  0x30   : > { %v4723_v13 = vsub.f32 %v234_v10, %v231_v11  ;;  %v5880_v16 = vld [vmem:[%s6928_s0 + $0x10] sm:$0xff]  ;;  %v4719_v17 = vsub.f32 %v5865_v12, %v5870_v14  ;;  %vm4733_vm1 = vcmp.gt.f32.partialorder %v4718_v8, 0.0  ;;  %v4724_v20 = vmul.f32 %v4721_v4, %v4718_v8  ;;  %v434_v36 = vld [vmem:[%s5832_s5] sm:$0xff]  ;;  %s5400_s18 = sshll.u32 %s5828_s28, 3  ;;  %s5485_s19 = sshll.u32 %s5697_s15, 7 }
  0x31   : > { %v4720_v18 = vsub.f32 %v5875_v15, %v5880_v16  ;;  %v4725_v19 = vmul.f32 %v4722_v9, %v4718_v8  ;;  %vm4737_vm2 = vcmp.gt.f32.partialorder %v4722_v9, 0.0  ;;  %vm5888_vm3 = vmand %vm4733_vm1, %vm4736_vm0  ;;  %v444_v44 = vcombine.high %v434_v36, %v434_v36  ;;  %v235_v48 = vld [vmem:[%s6928_s0 + $0x60] sm:$0xff]  ;;  %v435_v27 = vld [vmem:[%s5832_s5 + $0x8] sm:$0xff]  ;;  %s217_s21 = scalar_lea.vmem [#allocation5], %s5400_s18  ;;  %s6886_s30 = scalar_lea.hbm %s6931_s3, %s5485_s19 }
  0x32   : > { %331 = vperm.xlu1 %5569, %v232_v2   ;;  %272 = vperm.xlu0 %5568, %v226_v5   ;;  %v4726_v22 = vmul.f32 %v4723_v13, %v4718_v8  ;;  %vm5894_vm4 = vmand %vm4733_vm1, %vm4737_vm2  ;;  %v4727_v24 = vmul.f32 %v4721_v4, %v4719_v17  ;;  %vm4734_vm5 = vcmp.gt.f32.partialorder %v4719_v17, 0.0  ;;  %vm4738_vm6 = vcmp.gt.f32.partialorder %v4723_v13, 0.0  ;;  %v236_v34 = vld [vmem:[%s6929_s1] sm:$0x3]  ;;  %s5299_s22 = sshll.u32 %s217_s21, 4  ;;  %s5285_s4 = scalar_lea.sflag [#allocation4], %s5828_s28  ;;  %s5300_s22 = int_to_ptr.vmem [resolvable:$true] %s5299_s22 }
  0x33   : > { %v4761_v25 = vsel %vm5894_vm4, %v4725_v19, 1.0  ;;  %v4760_v26 = vsel %vm5888_vm3, %v4724_v20, 1.0  ;;  %vm5904_vm7 = vmand %vm4734_vm5, %vm4736_vm0  ;;  %v4729_v28 = vmul.f32 %v4723_v13, %v4719_v17  ;;  %v4728_v29 = vmul.f32 %v4722_v9, %v4719_v17  ;;  %s5723_s15 = smov [#allocation5]  }
  0x34   : > { %5579 = vrcp.f32 %v4761_v25  ;;  %v4763_v30 = vsel %vm5904_vm7, %v4727_v24, 1.0  ;;  %vm5912_vm8 = vmand %vm4733_vm1, %vm4738_vm6  ;;  %v4731_v32 = vmul.f32 %v4722_v9, %v4720_v18  ;;  %vm4735_vm9 = vcmp.gt.f32.partialorder %v4720_v18, 0.0 }
  0x35   : > { %5581 = vrcp.f32 %v4760_v26  ;;  %v4762_v33 = vsel %vm5912_vm8, %v4726_v22, 1.0  ;;  %vm5920_vm10 = vmand %vm4734_vm5, %vm4738_vm6  ;;  %v4730_v35 = vmul.f32 %v4721_v4, %v4720_v18  ;;  %v4732_v41 = vmul.f32 %v4723_v13, %v4720_v18 }
  0x36   : > { %336 = vperm.xlu1 %5569, %v233_v6   ;;  %315 = vperm.xlu0 %5568, %v230_v7   ;;  %5583 = vrcp.f32 %v4763_v30  ;;  %v4765_v37 = vsel %vm5920_vm10, %v4729_v28, 1.0  ;;  %vm5930_vm11 = vmand %vm4734_vm5, %vm4737_vm2  ;;  %v5950_v45 = vand.u32 4294901760, %v434_v36  ;;  %v5963_v50 = vand.u32 4294901760, %v444_v44  ;;  %v237_v30 = vld [vmem:[%s6929_s1 + $0x2] sm:$0x3] }
  0x37   : > { %5585 = vrcp.f32 %v4762_v33  ;;  %v4764_v39 = vsel %vm5930_vm11, %v4728_v29, 1.0  ;;  %vm5938_vm12 = vmand %vm4735_vm9, %vm4737_vm2  ;;  %vm4798_vm15 = vcmp.eq.f32.partialorder %v235_v48, %v4797_v49  ;;  %v239_v25 = vlaneseq }
  0x38   : > { %5587 = vrcp.f32 %v4765_v37  ;;  %v4767_v42 = vsel %vm5938_vm12, %v4731_v32, 1.0  ;;  %vm5946_vm13 = vmand %vm4735_vm9, %vm4736_vm0  ;;  %v5966_v51 = vsub.f32 %v434_v36, %v5950_v45  ;;  %v5971_v53 = vsub.f32 %v444_v44, %v5963_v50  ;;  %477 = vmatprep.subr.mxu0 %v5963_v50 }
  0x39   : > { %5589 = vrcp.f32 %v4764_v39  ;;  %v4766_v46 = vsel %vm5946_vm13, %v4730_v35, 1.0  ;;  %vm5956_vm14 = vmand %vm4735_vm9, %vm4738_vm6  ;;  %479 = vmatpush1.xpose.msra.mxu0 %v5950_v45  ;;  %v5473_v58 = vsel %vm4798_vm15, 1.0, %v5711_v57  ;;  %v6008_v26 = vshrl.u32 %v239_v25, 7 }
  0x3a   : > { %341 = vperm.xlu1 %5569, %v234_v10   ;;  %320 = vperm.xlu0 %5568, %v231_v11   ;;  %5591 = vrcp.f32 %v4767_v42  ;;  %v4768_v52 = vsel %vm5956_vm14, %v4732_v41, 1.0  ;;  %v566_v54 = vand.u32 4294901760, %v5966_v51  ;;  %v560_v55 = vand.u32 4294901760, %v5971_v53 }
  0x3b   : > { %5593 = vrcp.f32 %v4766_v46  ;;  %642 = vmatprep.subr.mxu0 %v5971_v53  ;;  %v919_v28 = vcombine.high %v435_v27, %v435_v27  ;;  %v245_v29 = vsub.s32 1, %v6008_v26  ;;  %v241_v31 = vsub.s32 0, %v6008_v26 }
  0x3c   : > { %v567_v56 = vsub.f32 %v5966_v51, %v566_v54  ;;  %5595 = vrcp.f32 %v4768_v52  ;;  %v561_v59 = vsub.f32 %v5971_v53, %v560_v55  ;;  %v6029_v41 = vand.u32 4294901760, %v435_v27 }
  0x3d   : > { %v6019_v35 = vand.u32 4294901760, %v919_v28  ;;  %v6021_v36 = vrot.slane %v237_v30, %v245_v29  ;;  %v6023_v37 = vrot.slane %v237_v30, %v241_v31  ;;  %v6025_v38 = vrot.slane %v236_v34, %v245_v29 }
  0x3e   : > { %277 = vperm.xlu1 %5569, %v5865_v12   ;;  %256 = vperm.xlu0 %5568, %v5870_v14   ;;  %v568_v61 = vand.u32 4294901760, %v567_v56  ;;  %v562_v0 = vand.u32 4294901760, %v561_v59  ;;  %v6035_v43 = vrot.slane %v236_v34, %v241_v31  ;;  %v6055_v56 = vsub.f32 %v435_v27, %v6029_v41 }
  0x3f   : > { %v6032_v42 = vsub.f32 %v919_v28, %v6019_v35  ;;  %v437_v28 = vld [vmem:[%s5832_s5 + $0x18] sm:$0xff] }
  0x40   : > { %563 = vmatprep.subr.mxu1 %v562_v0 }
  0x41   : > { %v5580_v60 = vpop.eup %5579  ;;  %569 = vmatpush1.xpose.msra.mxu1 %v568_v61  ;;  %v1035_v52 = vand.u32 4294901760, %v6032_v42 }
  0x42   : > { %282 = vperm.xlu1 %5569, %v5875_v15   ;;  %261 = vperm.xlu0 %5568, %v5880_v16   ;;  %v5582_v62 = vpop.eup %5581  ;;  %v4788_v63 = vsel %vm5894_vm4, %v5580_v60, 0.0  ;;  %v6992_v60 = vmov 0 }
  0x43   : > { %v5584_v1 = vpop.eup %5583  ;;  %v4802_v2 = vmul.f32 %v5473_v58, %v4788_v63  ;;  %v4787_v3 = vsel %vm5888_vm3, %v5582_v62, 0.0  ;;  %719 = vmatprep.subr.mxu1 %v5963_v50  ;;  %v5712_v62 = vmov 1.0  }
  0x44   : > { %v5586_v4 = vpop.eup %5585  ;;  %v4801_v5 = vmul.f32 %v5473_v58, %v4787_v3  ;;  %v4790_v6 = vsel %vm5904_vm7, %v5584_v1, 0.0 }
  0x45   : > { %v5588_v7 = vpop.eup %5587  ;;  %v4804_v8 = vmul.f32 %v5473_v58, %v4790_v6  ;;  %v4789_v9 = vsel %vm5912_vm8, %v5586_v4, 0.0  ;;  %v1036_v4 = vsub.f32 %v6032_v42, %v1035_v52 }
  0x46   : > { %4817 = vperm.xlu1 %5569, %v4802_v2   ;;  %v5590_v10 = vpop.eup %5589  ;;  %4812 = vperm.xlu0 %5568, %v4801_v5   ;;  %v4803_v11 = vmul.f32 %v5473_v58, %v4789_v9  ;;  %v4792_v12 = vsel %vm5920_vm10, %v5588_v7, 0.0  ;;  %v1041_v5 = vand.u32 4294901760, %v6055_v56 }
  0x47   : > { %v5592_v13 = vpop.eup %5591  ;;  %v4791_v14 = vsel %vm5930_vm11, %v5590_v10, 0.0  ;;  %v4806_v16 = vmul.f32 %v5473_v58, %v4792_v12 }
  0x48   : > { %v5594_v15 = vpop.eup %5593  ;;  %v4805_v17 = vmul.f32 %v5473_v58, %v4791_v14  ;;  %v4794_v18 = vsel %vm5938_vm12, %v5592_v13, 0.0 }
  0x49   : > { %v4793_v19 = vsel %vm5946_vm13, %v5594_v15, 0.0  ;;  %v5596_v20 = vpop.eup %5595  ;;  %v4808_v21 = vmul.f32 %v5473_v58, %v4794_v18 }
  0x4a   : > { %4827 = vperm.xlu1 %5569, %v4804_v8   ;;  %4822 = vperm.xlu0 %5568, %v4803_v11   ;;  %v4807_v22 = vmul.f32 %v5473_v58, %v4793_v19  ;;  %v4795_v23 = vsel %vm5956_vm14, %v5596_v20, 0.0 }
  0x4b   : > { %v4809_v24 = vmul.f32 %v5473_v58, %v4795_v23  ;;  %v436_v58 = vld [vmem:[%s5832_s5 + $0x10] sm:$0xff] }
  0x4c   : > { %v1394_v2 = vcombine.high %v436_v58, %v436_v58  ;;  %v6116_v15 = vand.u32 4294901760, %v436_v58 }
  0x4e   : > { %4837 = vperm.xlu1 %5569, %v4806_v16   ;;  %4832 = vperm.xlu0 %5568, %v4805_v17   ;;  %v6114_v14 = vand.u32 4294901760, %v1394_v2  ;;  %v1037_v16 = vand.u32 4294901760, %v1036_v4  ;;  %v1042_v17 = vsub.f32 %v6055_v56, %v1041_v5  ;;  %v6139_v25 = vsub.f32 %v436_v58, %v6116_v15 }
  0x4f   : > { %v6251_v4 = vand.u32 4294901760, %v437_v28 }
  0x50   : > { %v1043_v31 = vand.u32 4294901760, %v1042_v17 }
  0x51   : > { %v6291_v17 = vsub.f32 %v437_v28, %v6251_v4 }
  0x52   : > { %4847 = vperm.xlu1 %5569, %v4808_v21   ;;  %4842 = vperm.xlu0 %5568, %v4807_v22  }
  0x56   : > { %4852 = vperm.xlu0 %5568, %v4809_v24   ;;  %v6136_v24 = vsub.f32 %v1394_v2, %v6114_v14 }
  0xa9   : > { %v311_v32 = vpop.permute.xlu1 %310  ;;  %v252_v33 = vpop.permute.xlu0 %251 }
  0xaa   : > { %vm324_vm2 = vcmp.ge.f32.partialorder %v6021_v36, %v311_v32  ;;  %vm323_vm4 = vcmp.ge.f32.partialorder %v6023_v37, %v311_v32  ;;  %vm265_vm6 = vcmp.ge.f32.partialorder %v6025_v38, %v252_v33  ;;  %vm264_vm10 = vcmp.ge.f32.partialorder %v6035_v43, %v252_v33 }
  0xad   : > { %v332_v39 = vpop.permute.xlu1 %331  ;;  %v273_v40 = vpop.permute.xlu0 %272 }
  0xae   : > { %vm344_vm0 = vcmp.lt.f32.partialorder %v6023_v37, %v332_v39  ;;  %vm345_vm1 = vcmp.lt.f32.partialorder %v6021_v36, %v332_v39  ;;  %vm286_vm3 = vcmp.lt.f32.partialorder %v6025_v38, %v273_v40  ;;  %vm285_vm8 = vcmp.lt.f32.partialorder %v6035_v43, %v273_v40 }
  0xaf   : > { %vm6039_vm5 = vmand %vm324_vm2, %vm345_vm1  ;;  %v1869_v39 = vcombine.high %v437_v28, %v437_v28 }
  0xb0   : > { %vm6044_vm7 = vmand %vm323_vm4, %vm344_vm0 }
  0xb1   : > { %v337_v47 = vpop.permute.xlu1 %336  ;;  %v316_v48 = vpop.permute.xlu0 %315  ;;  %vm6049_vm9 = vmand %vm265_vm6, %vm286_vm3 }
  0xb2   : > { %vm346_vm11 = vcmp.lt.f32.partialorder %v6023_v37, %v337_v47  ;;  %vm6064_vm12 = vmand %vm6049_vm9, %vm6039_vm5  ;;  %vm325_vm13 = vcmp.ge.f32.partialorder %v6023_v37, %v316_v48  ;;  %vm347_vm2 = vcmp.lt.f32.partialorder %v6021_v36, %v337_v47  ;;  %vm326_vm3 = vcmp.ge.f32.partialorder %v6021_v36, %v316_v48 }
  0xb3   : > { %vm6069_vm14 = vmand %vm264_vm10, %vm285_vm8  ;;  %v5402_v61 = vsel %vm6064_vm12, 1.0, %v5711_v57  ;;  %5419 = vmatprep.mubr.msk.f32.mxu1 %vm6064_vm12, %v5712_v62  ;;  %v6990_v48 = vmov 0 }
  0xb4   : > { %v513_v63 = vsub.f32 %v5402_v61, %v5402_v61  ;;  %vm6079_vm15 = vmand %vm325_vm13, %vm346_vm11 }
  0xb5   : > { %v342_v0 = vpop.permute.xlu1 %341  ;;  %v321_v1 = vpop.permute.xlu0 %320  ;;  %vm6091_vm0 = vmand %vm6069_vm14, %vm6044_vm7 }
  0xb6   : > { %v514_v7 = vand.u32 4294901760, %v513_v63  ;;  %v5401_v8 = vsel %vm6091_vm0, 1.0, %v5711_v57  ;;  %5420 = vmatmul.mubr.msk.f32.vlgmr.msra.gmra.mxu1 %vm6091_vm0, %v5712_v62  ;;  %vm6105_vm1 = vmand %vm6069_vm14, %vm6079_vm15  ;;  %vm348_vm4 = vcmp.lt.f32.partialorder %v6023_v37, %v342_v0  ;;  %vm327_vm6 = vcmp.ge.f32.partialorder %v6023_v37, %v321_v1 }
  0xb7   : > { %v519_v10 = vsub.f32 %v5401_v8, %v5401_v8  ;;  %721 = vmatpush1.xpose.msra.mxu1 %v5950_v45  ;;  %v5403_v20 = vsel %vm6105_vm1, 1.0, %v5711_v57  ;;  %vm349_vm8 = vcmp.lt.f32.partialorder %v6021_v36, %v342_v0  ;;  %vm328_vm10 = vcmp.ge.f32.partialorder %v6021_v36, %v321_v1  ;;  %vm6131_vm11 = vmand %vm326_vm3, %vm347_vm2 }
  0xb8   : > { %757 = vmatprep.mubr.f32.mxu1 %v514_v7  ;;  %v515_v13 = vsub.f32 %v513_v63, %v514_v7  ;;  %875 = vmatprep.subr.mxu1 %v5963_v50  ;;  %v6978_v50 = vmov 0  ;;  %vm6143_vm13 = vmand %vm327_vm6, %vm348_vm4  ;;  %v6154_v29 = vsub.f32 %v5403_v20, %v5403_v20  ;;  %v1510_v36 = vand.u32 4294901760, %v6136_v24 }
  0xb9   : > { %v6110_v11 = vpop.permute.xlu1 %277  ;;  %v6112_v12 = vpop.permute.xlu0 %256  ;;  %v520_v18 = vand.u32 4294901760, %v519_v10  ;;  %v6979_v50 = vsel %vm6131_vm11, 4294967295, %v6978_v50  ;;  %vm6160_vm4 = vmand %vm328_vm10, %vm349_vm8  ;;  %v1516_v37 = vand.u32 4294901760, %v6139_v25  ;;  %v7008_v20 = vmov 0 }
  0xba   : > { %v516_v19 = vand.u32 4294901760, %v515_v13  ;;  %vm6168_vm6 = vmand %vm6049_vm9, %vm6131_vm11  ;;  %v995_v58 = vand.u32 4294901760, %v6154_v29  ;;  %v1511_v0 = vsub.f32 %v6136_v24, %v1510_v36 }
  0xbb   : > { %761 = vmatmul.mubr.f32.vlgmr.msra.gmra.mxu1 %v520_v18  ;;  %v521_v21 = vsub.f32 %v519_v10, %v520_v18  ;;  %v5404_v33 = vsel %vm6168_vm6, 1.0, %v5711_v57  ;;  %vm6188_vm10 = vmand %vm6069_vm14, %vm6143_vm13  ;;  %v1517_v53 = vsub.f32 %v6139_v25, %v1516_v37  ;;  %v438_v18 = vld [vmem:[%s5832_s5 + $0x20] sm:$0xff] }
  0xbc   : > { %517 = vmatprep.mubr.f32.mxu0 %v516_v19  ;;  %877 = vmatpush1.xpose.msra.mxu1 %v5950_v45  ;;  %v988_v47 = vsub.f32 %v5404_v33, %v5404_v33  ;;  %v5405_v7 = vsel %vm6188_vm10, 1.0, %v5711_v57 }
  0xbd   : > { %v283_v22 = vpop.permute.xlu1 %282  ;;  %v262_v23 = vpop.permute.xlu0 %261  ;;  %5423 = vmatprep.mubr.msk.f32.mxu1 %vm6064_vm12, %v5712_v62  ;;  %v522_v45 = vand.u32 4294901760, %v521_v21  ;;  %1038 = vmatprep.subr.mxu1 %v1037_v16  ;;  %v6302_v6 = vsub.f32 %v5405_v7, %v5405_v7 }
  0xbe   : > { %vm289_vm2 = vcmp.lt.f32.partialorder %v6035_v43, %v283_v22  ;;  %vm268_vm3 = vcmp.ge.f32.partialorder %v6035_v43, %v262_v23  ;;  %v989_v61 = vand.u32 4294901760, %v988_v47 }
  0xbf   : > { %523 = vmatmul.mubr.f32.vlgmr.msra.gmra.mxu0 %v522_v45  ;;  %5424 = vmatmul.mubr.msk.f32.vlgmr.msra.gmra.mxu1 %vm6091_vm0, %v5712_v62  ;;  %vm6178_vm8 = vmand %vm268_vm3, %vm289_vm2  ;;  %vm6998_vm3 = vcmp.lt.f32.partialorder %v6025_v38, %v283_v22  ;;  %v1470_v22 = vand.u32 4294901760, %v6302_v6 }
  0xc0   : > { %645 = vmatpush1.xpose.msra.mxu0 %v5966_v51  ;;  %680 = vmatprep.mubr.f32.mxu0 %v513_v63  ;;  %vm6200_vm2 = vmand %vm6178_vm8, %vm6044_vm7  ;;  %v6994_v63 = vmov 0  ;;  %v990_v1 = vsub.f32 %v988_v47, %v989_v61 }
  0xc1   : > { %1044 = vmatpush1.xpose.msra.mxu1 %v1043_v31  ;;  %5425 = vmatprep.mubr.msk.f32.mxu1 %vm6168_vm6, %v5712_v62  ;;  %v6991_v48 = vsel %vm6200_vm2, 4294967295, %v6990_v48  ;;  %vm6211_vm11 = vmand %vm6178_vm8, %vm6079_vm15 }
  0xc2   : > { %v6993_v60 = vsel %vm6211_vm11, 4294967295, %v6992_v60  ;;  %799 = vmatprep.subr.mxu0 %v560_v55  ;;  %1194 = vmatprep.subr.mxu1 %v6019_v35  ;;  %vm6222_vm14 = vmand %vm6178_vm8, %vm6143_vm13  ;;  %v6232_v55 = vand.u32 4294901760, %v1869_v39  ;;  %vm267_vm8 = vcmp.ge.f32.partialorder %v6025_v38, %v6112_v12  ;;  %vm6999_vm11 = vcmp.ge.f32.partialorder %v6025_v38, %v262_v23 }
  0xc3   : > { %v6995_v63 = vsel %vm6222_vm14, 4294967295, %v6994_v63  ;;  %683 = vmatmul.mubr.f32.vlgmr.msra.gmra.mxu0 %v519_v10  ;;  %vm6247_vm14 = vmand %vm6049_vm9, %vm6160_vm4  ;;  %vm7002_vm9 = vcmp.lt.f32.partialorder %v6025_v38, %v6110_v11  ;;  %v991_v8 = vand.u32 4294901760, %v990_v1  ;;  %v1512_v10 = vand.u32 4294901760, %v1511_v0 }
  0xc4   : > { %803 = vmatpush1.xpose.msra.mxu0 %v566_v54  ;;  %5426 = vmatmul.mubr.msk.f32.vlgmr.msra.gmra.mxu1 %vm6105_vm1, %v5712_v62  ;;  %vm6257_vm2 = vmand %vm6999_vm11, %vm6998_vm3  ;;  %v996_v54 = vsub.f32 %v6154_v29, %v995_v58  ;;  %v5406_v49 = vsel %vm6247_vm14, 1.0, %v5711_v57  ;;  %v6287_v16 = vsub.f32 %v1869_v39, %v6232_v55  ;;  %v1518_v38 = vand.u32 4294901760, %v1517_v53 }
  0xc5   : > { %5421 = vmatprep.mubr.msk.f32.mxu0 %vm6064_vm12, %v5712_v62  ;;  %1196 = vmatpush1.xpose.msra.mxu1 %v6029_v41  ;;  %vm6276_vm12 = vmand %vm267_vm8, %vm7002_vm9  ;;  %v6284_v13 = vsub.f32 %v5406_v49, %v5406_v49  ;;  %vm287_vm11 = vcmp.lt.f32.partialorder %v6035_v43, %v6110_v11  ;;  %vm266_vm3 = vcmp.ge.f32.partialorder %v6035_v43, %v6112_v12  ;;  %v1991_v23 = vand.u32 4294901760, %v6291_v17 }
  0xc6   : > { %1232 = vmatprep.mubr.f32.mxu1 %v989_v61  ;;  %952 = vmatprep.subr.mxu0 %v6019_v35  ;;  %v997_v19 = vand.u32 4294901760, %v996_v54  ;;  %vm7007_vm8 = vnez %v6979_v50  ;;  %v1985_v11 = vand.u32 4294901760, %v6287_v16  ;;  %v2344_v12 = vcombine.high %v438_v18, %v438_v18 }
  0xc7   : > { %5422 = vmatmul.mubr.msk.f32.vlgmr.msra.gmra.mxu0 %vm6091_vm0, %v5712_v62  ;;  %1350 = vmatprep.subr.mxu1 %v6019_v35  ;;  %vm6298_vm0 = vmand %vm6257_vm2, %vm6039_vm5  ;;  %v7005_v35 = vmov 0  ;;  %v1464_v43 = vand.u32 4294901760, %v6284_v13 }
  0xc8   : > { %954 = vmatpush1.xpose.msra.mxu0 %v6029_v41  ;;  %1236 = vmatmul.mubr.f32.vlgmr.msra.gmra.mxu1 %v995_v58  ;;  %v7006_v35 = vsel %vm6298_vm0, 4294967295, %v7005_v35  ;;  %vm6313_vm9 = vmand %vm6257_vm2, %vm7007_vm8  ;;  %v1986_v31 = vsub.f32 %v6287_v16, %v1985_v11 }
  0xc9   : > { %992 = vmatprep.mubr.f32.mxu0 %v991_v8  ;;  %1352 = vmatpush1.xpose.msra.mxu1 %v6029_v41  ;;  %v7009_v20 = vsel %vm6313_vm9, 4294967295, %v7008_v20  ;;  %vm6325_vm0 = vmand %vm6257_vm2, %vm6160_vm4  ;;  %v1465_v44 = vsub.f32 %v6284_v13, %v1464_v43 }
  0xca   : > { %5429 = vmatprep.mubr.msk.f32.mxu1 %vm6168_vm6, %v5712_v62  ;;  %1117 = vmatprep.subr.mxu0 %v6032_v42  ;;  %vm6331_vm9 = vmand %vm266_vm3, %vm287_vm11  ;;  %v6368_v42 = vand.u32 4294901760, %v2344_v12  ;;  %v1987_v33 = vand.u32 4294901760, %v1986_v31  ;;  %vm5270_vm3 = vcmask 97280  }
  0xcb   : > { %998 = vmatmul.mubr.f32.vlgmr.msra.gmra.mxu0 %v997_v19  ;;  %1513 = vmatprep.subr.mxu1 %v1512_v10  ;;  %vm6345_vm2 = vmand %vm6276_vm12, %vm6039_vm5  ;;  %v1466_v32 = vand.u32 4294901760, %v1465_v44 }
  0xcc   : > { %1120 = vmatpush1.xpose.msra.mxu0 %v6055_v56  ;;  %5430 = vmatmul.mubr.msk.f32.vlgmr.msra.gmra.mxu1 %vm6105_vm1, %v5712_v62  ;;  %vm6358_vm11 = vmand %vm6331_vm9, %vm6044_vm7  ;;  %v5408_v46 = vsel %vm6345_vm2, 1.0, %v5711_v57  ;;  %v1992_v56 = vsub.f32 %v6291_v17, %v1991_v23  ;;  %v6399_v39 = vsub.f32 %v2344_v12, %v6368_v42 }
  0xcd   : > { %1155 = vmatprep.mubr.f32.mxu0 %v988_v47  ;;  %1519 = vmatpush1.xpose.msra.mxu1 %v1518_v38  ;;  %v6396_v34 = vsub.f32 %v5408_v46, %v5408_v46  ;;  %v439_v47 = vld [vmem:[%s5832_s5 + $0x28] sm:$0xff]  ;;  %vm6426_vm5 = vmand %vm6276_vm12, %vm7007_vm8  ;;  %vm5272_vm8 = vcmask 130048  }
  0xce   : > { %5431 = vmatprep.mubr.msk.f32.mxu1 %vm6247_vm14, %v5712_v62  ;;  %1274 = vmatprep.subr.mxu0 %v1035_v52  ;;  %v1471_v52 = vsub.f32 %v6302_v6, %v1470_v22  ;;  %v1993_v61 = vand.u32 4294901760, %v1992_v56  ;;  %v2460_v53 = vand.u32 4294901760, %v6399_v39  ;;  %v2819_v1 = vcombine.high %v439_v47, %v439_v47  ;;  %vm6439_vm7 = vmand %vm6331_vm9, %vm6079_vm15 }
  0xcf   : > { %1158 = vmatmul.mubr.f32.vlgmr.msra.gmra.mxu0 %v6154_v29  ;;  %1669 = vmatprep.subr.mxu1 %v6114_v14  ;;  %v5407_v29 = vsel %vm6358_vm11, 1.0, %v5711_v57  ;;  %v1939_v0 = vand.u32 4294901760, %v6396_v34  ;;  %v5410_v3 = vsel %vm6426_vm5, 1.0, %v5711_v57  ;;  %v5409_v8 = vsel %vm6439_vm7, 1.0, %v5711_v57  ;;  %vm6507_vm15 = vmand %vm6276_vm12, %vm6160_vm4 }
  0xd0   : > { %1278 = vmatpush1.xpose.msra.mxu0 %v1041_v5  ;;  %5432 = vmatmul.mubr.msk.f32.vlgmr.msra.gmra.mxu1 %vm6188_vm10, %v5712_v62  ;;  %v6386_v5 = vand.u32 4294901760, %v438_v18  ;;  %v6403_v58 = vsub.f32 %v5407_v29, %v5407_v29  ;;  %v1472_v9 = vand.u32 4294901760, %v1471_v52  ;;  %v2461_v7 = vsub.f32 %v6399_v39, %v2460_v53 }
  0xd1   : > { %5427 = vmatprep.mubr.msk.f32.mxu0 %vm6168_vm6, %v5712_v62  ;;  %1671 = vmatpush1.xpose.msra.mxu1 %v6116_v15  ;;  %v1940_v50 = vsub.f32 %v6396_v34, %v1939_v0  ;;  %v5412_v27 = vsel %vm6507_vm15, 1.0, %v5711_v57  ;;  %vm7027_vm4 = vnez %v6991_v48  ;;  %vm7028_vm6 = vnez %v7009_v20 }
  0xd2   : > { %1707 = vmatprep.mubr.f32.mxu1 %v1464_v43  ;;  %1427 = vmatprep.subr.mxu0 %v6114_v14  ;;  %v2462_v10 = vand.u32 4294901760, %v2461_v7  ;;  %v6558_v56 = vsub.f32 %v5412_v27, %v5412_v27  ;;  %vm5266_vm12 = vcmask 31744  }
  0xd3   : > { %5428 = vmatmul.mubr.msk.f32.vlgmr.msra.gmra.mxu0 %vm6105_vm1, %v5712_v62  ;;  %1825 = vmatprep.subr.mxu1 %v6114_v14  ;;  %v6407_v14 = vsub.f32 %v438_v18, %v6386_v5  ;;  %v1941_v2 = vand.u32 4294901760, %v1940_v50  ;;  %v440_v18 = vld [vmem:[%s5832_s5 + $0x30] sm:$0xff]  ;;  %vm6520_vm1 = vmand %vm6331_vm9, %vm6143_vm13  ;;  %vm7026_vm13 = vnez %v7006_v35  ;;  %v5413_v50 = vsel %vm7027_vm4, 1.0, %v5711_v57 }
  0xd4   : > { %1429 = vmatpush1.xpose.msra.mxu0 %v6116_v15  ;;  %1711 = vmatmul.mubr.f32.vlgmr.msra.gmra.mxu1 %v1470_v22  ;;  %v3294_v22 = vcombine.high %v440_v18, %v440_v18  ;;  %v6548_v21 = vand.u32 4294901760, %v440_v18  ;;  %vm5274_vm9 = vcmask 162816  }
  0xd5   : > { %1467 = vmatprep.mubr.f32.mxu0 %v1466_v32  ;;  %1827 = vmatpush1.xpose.msra.mxu1 %v6116_v15  ;;  %v1945_v15 = vand.u32 4294901760, %v6403_v58  ;;  %v2466_v51 = vand.u32 4294901760, %v6407_v14  ;;  %v441_v32 = vld [vmem:[%s5832_s5 + $0x38] sm:$0xff] }
  0xd6   : > { %5435 = vmatprep.mubr.msk.f32.mxu1 %vm6247_vm14, %v5712_v62  ;;  %1592 = vmatprep.subr.mxu0 %v6136_v24  ;;  %v6449_v24 = vand.u32 4294901760, %v2819_v1 }
  0xd7   : > { %1473 = vmatmul.mubr.f32.vlgmr.msra.gmra.mxu0 %v1472_v9  ;;  %1988 = vmatprep.subr.mxu1 %v1987_v33  ;;  %v3769_v9 = vcombine.high %v441_v32, %v441_v32 }
  0xd8   : > { %1595 = vmatpush1.xpose.msra.mxu0 %v6139_v25  ;;  %5436 = vmatmul.mubr.msk.f32.vlgmr.msra.gmra.mxu1 %vm6188_vm10, %v5712_v62  ;;  %v2467_v25 = vsub.f32 %v6407_v14, %v2466_v51  ;;  %v6480_v38 = vsub.f32 %v2819_v1, %v6449_v24 }
  0xd9   : > { %1630 = vmatprep.mubr.f32.mxu0 %v6284_v13  ;;  %1994 = vmatpush1.xpose.msra.mxu1 %v1993_v61  ;;  %v6477_v13 = vsub.f32 %v5410_v3, %v5410_v3 }
  0xda   : > { %5437 = vmatprep.mubr.msk.f32.mxu1 %vm6345_vm2, %v5712_v62  ;;  %1749 = vmatprep.subr.mxu0 %v1510_v36  ;;  %v1946_v36 = vsub.f32 %v6403_v58, %v1945_v15  ;;  %v2468_v19 = vand.u32 4294901760, %v2467_v25  ;;  %v2935_v12 = vand.u32 4294901760, %v6480_v38  ;;  %v442_v25 = vld [vmem:[%s5832_s5 + $0x40] sm:$0xff]  ;;  %s5715_s5 = smov 8  }
  0xdb   : > { %1633 = vmatmul.mubr.f32.vlgmr.msra.gmra.mxu0 %v6302_v6  ;;  %2144 = vmatprep.subr.mxu1 %v6232_v55  ;;  %v6484_v6 = vsub.f32 %v5409_v8, %v5409_v8  ;;  %v2414_v43 = vand.u32 4294901760, %v6477_v13  ;;  %v6630_v8 = vsub.f32 %v5413_v50, %v5413_v50 }
  0xdc   : > { %1753 = vmatpush1.xpose.msra.mxu0 %v1516_v37  ;;  %5438 = vmatmul.mubr.msk.f32.vlgmr.msra.gmra.mxu1 %vm6358_vm11, %v5712_v62  ;;  %v6467_v37 = vand.u32 4294901760, %v439_v47  ;;  %v1947_v40 = vand.u32 4294901760, %v1946_v36  ;;  %v2936_v59 = vsub.f32 %v6480_v38, %v2935_v12 }
  0xdd   : > { %5433 = vmatprep.mubr.msk.f32.mxu0 %vm6247_vm14, %v5712_v62  ;;  %2146 = vmatpush1.xpose.msra.mxu1 %v6251_v4  ;;  %v2415_v30 = vsub.f32 %v6477_v13, %v2414_v43  ;;  %vm7030_vm14 = vnez %v6995_v63 }
  0xde   : > { %2182 = vmatprep.mubr.f32.mxu1 %v1939_v0  ;;  %1902 = vmatprep.subr.mxu0 %v6232_v55  ;;  %v2937_v52 = vand.u32 4294901760, %v2936_v59 }
  0xdf   : > { %5434 = vmatmul.mubr.msk.f32.vlgmr.msra.gmra.mxu0 %vm6188_vm10, %v5712_v62  ;;  %2300 = vmatprep.subr.mxu1 %v6232_v55  ;;  %v6488_v55 = vsub.f32 %v439_v47, %v6467_v37  ;;  %v2416_v28 = vand.u32 4294901760, %v2415_v30  ;;  %v2889_v47 = vand.u32 4294901760, %v6558_v56  ;;  %vm7029_vm10 = vnez %v6993_v60 }
  0xe0   : > { %1904 = vmatpush1.xpose.msra.mxu0 %v6251_v4  ;;  %2186 = vmatmul.mubr.f32.vlgmr.msra.gmra.mxu1 %v1945_v15  ;;  %v6595_v15 = vand.u32 4294901760, %v3769_v9 }
  0xe1   : > { %1942 = vmatprep.mubr.f32.mxu0 %v1941_v2  ;;  %2302 = vmatpush1.xpose.msra.mxu1 %v6251_v4  ;;  %v2420_v4 = vand.u32 4294901760, %v6484_v6  ;;  %v2941_v44 = vand.u32 4294901760, %v6488_v55  ;;  %v2890_v0 = vsub.f32 %v6558_v56, %v2889_v47 }
  0xe2   : > { %5441 = vmatprep.mubr.msk.f32.mxu1 %vm6345_vm2, %v5712_v62  ;;  %2067 = vmatprep.subr.mxu0 %v6287_v16  ;;  %v6530_v16 = vand.u32 4294901760, %v3294_v22  ;;  %v6626_v36 = vsub.f32 %v3769_v9, %v6595_v15 }
  0xe3   : > { %1948 = vmatmul.mubr.f32.vlgmr.msra.gmra.mxu0 %v1947_v40  ;;  %2463 = vmatprep.subr.mxu1 %v2462_v10  ;;  %v2891_v54 = vand.u32 4294901760, %v2890_v0 }
  0xe4   : > { %2070 = vmatpush1.xpose.msra.mxu0 %v6291_v17  ;;  %5442 = vmatmul.mubr.msk.f32.vlgmr.msra.gmra.mxu1 %vm6358_vm11, %v5712_v62  ;;  %v2942_v17 = vsub.f32 %v6488_v55, %v2941_v44  ;;  %v6561_v29 = vsub.f32 %v3294_v22, %v6530_v16  ;;  %v6678_v22 = vand.u32 4294901760, %v442_v25 }
  0xe5   : > { %2105 = vmatprep.mubr.f32.mxu0 %v6396_v34  ;;  %2469 = vmatpush1.xpose.msra.mxu1 %v2468_v19 }
  0xe6   : > { %5443 = vmatprep.mubr.msk.f32.mxu1 %vm6426_vm5, %v5712_v62  ;;  %2224 = vmatprep.subr.mxu0 %v1985_v11  ;;  %v2421_v11 = vsub.f32 %v6484_v6, %v2420_v4  ;;  %v2943_v34 = vand.u32 4294901760, %v2942_v17  ;;  %v6694_v46 = vsub.f32 %v442_v25, %v6678_v22 }
  0xe7   : > { %2108 = vmatmul.mubr.f32.vlgmr.msra.gmra.mxu0 %v6403_v58  ;;  %2619 = vmatprep.subr.mxu1 %v6368_v42  ;;  %v3410_v58 = vand.u32 4294901760, %v6561_v29 }
  0xe8   : > { %2228 = vmatpush1.xpose.msra.mxu0 %v1991_v23  ;;  %5444 = vmatmul.mubr.msk.f32.vlgmr.msra.gmra.mxu1 %vm6439_vm7, %v5712_v62  ;;  %v5411_v23 = vsel %vm6520_vm1, 1.0, %v5711_v57  ;;  %v2422_v45 = vand.u32 4294901760, %v2421_v11 }
  0xe9   : > { %5439 = vmatprep.mubr.msk.f32.mxu0 %vm6345_vm2, %v5712_v62  ;;  %2621 = vmatpush1.xpose.msra.mxu1 %v6386_v5  ;;  %v6565_v33 = vsub.f32 %v5411_v23, %v5411_v23  ;;  %v3411_v1 = vsub.f32 %v6561_v29, %v3410_v58  ;;  %vm5276_vm2 = vcmask 195584  }
  0xea   : > { %2657 = vmatprep.mubr.f32.mxu1 %v2414_v43  ;;  %2377 = vmatprep.subr.mxu0 %v6368_v42 }
  0xeb   : > { %5440 = vmatmul.mubr.msk.f32.vlgmr.msra.gmra.mxu0 %vm6358_vm11, %v5712_v62  ;;  %2775 = vmatprep.subr.mxu1 %v6368_v42  ;;  %v6569_v42 = vsub.f32 %v440_v18, %v6548_v21  ;;  %v3412_v7 = vand.u32 4294901760, %v3411_v1  ;;  %v4244_v18 = vcombine.high %v442_v25, %v442_v25  ;;  %vm5278_vm11 = vcmask 228352  }
  0xec   : > { %2379 = vmatpush1.xpose.msra.mxu0 %v6386_v5  ;;  %2661 = vmatmul.mubr.f32.vlgmr.msra.gmra.mxu1 %v2420_v4  ;;  %v5415_v4 = vsel %vm7029_vm10, 1.0, %v5711_v57 }
  0xed   : > { %2417 = vmatprep.mubr.f32.mxu0 %v2416_v28  ;;  %2777 = vmatpush1.xpose.msra.mxu1 %v6386_v5  ;;  %v2895_v5 = vand.u32 4294901760, %v6565_v33  ;;  %v3416_v61 = vand.u32 4294901760, %v6569_v42  ;;  %v6660_v43 = vand.u32 4294901760, %v4244_v18  ;;  %v3844_v27 = vsub.f32 %v5415_v4, %v5415_v4 }
  0xee   : > { %5447 = vmatprep.mubr.msk.f32.mxu1 %vm6426_vm5, %v5712_v62  ;;  %2542 = vmatprep.subr.mxu0 %v6399_v39  ;;  %v5414_v39 = vsel %vm7026_vm13, 1.0, %v5711_v57  ;;  %v4366_v28 = vand.u32 4294901760, %v6694_v46 }
  0xef   : > { %2423 = vmatmul.mubr.f32.vlgmr.msra.gmra.mxu0 %v2422_v45  ;;  %2938 = vmatprep.subr.mxu1 %v2937_v52  ;;  %v6623_v3 = vsub.f32 %v5414_v39, %v5414_v39  ;;  %v6689_v59 = vsub.f32 %v4244_v18, %v6660_v43  ;;  %v5417_v45 = vsel %vm7030_vm14, 1.0, %v5711_v57 }
  0xf0   : > { %2545 = vmatpush1.xpose.msra.mxu0 %v6407_v14  ;;  %5448 = vmatmul.mubr.msk.f32.vlgmr.msra.gmra.mxu1 %vm6439_vm7, %v5712_v62  ;;  %v3417_v14 = vsub.f32 %v6569_v42, %v3416_v61 }
  0xf1   : > { %2580 = vmatprep.mubr.f32.mxu0 %v6477_v13  ;;  %2944 = vmatpush1.xpose.msra.mxu1 %v2943_v34  ;;  %v3364_v10 = vand.u32 4294901760, %v6623_v3  ;;  %v3885_v13 = vand.u32 4294901760, %v6626_v36  ;;  %v4360_v23 = vand.u32 4294901760, %v6689_v59 }
  0xf2   : > { %5449 = vmatprep.mubr.msk.f32.mxu1 %vm6507_vm15, %v5712_v62  ;;  %2699 = vmatprep.subr.mxu0 %v2460_v53  ;;  %v2896_v53 = vsub.f32 %v6565_v33, %v2895_v5  ;;  %v3418_v2 = vand.u32 4294901760, %v3417_v14 }
  0xf3   : > { %2583 = vmatmul.mubr.f32.vlgmr.msra.gmra.mxu0 %v6484_v6  ;;  %3094 = vmatprep.subr.mxu1 %v6449_v24  ;;  %v3365_v40 = vsub.f32 %v6623_v3, %v3364_v10  ;;  %v3886_v19 = vsub.f32 %v6626_v36, %v3885_v13 }
  0xf4   : > { %2703 = vmatpush1.xpose.msra.mxu0 %v2466_v51  ;;  %5450 = vmatmul.mubr.msk.f32.vlgmr.msra.gmra.mxu1 %vm6520_vm1, %v5712_v62  ;;  %v6613_v51 = vand.u32 4294901760, %v441_v32  ;;  %v2897_v49 = vand.u32 4294901760, %v2896_v53 }
  0xf5   : > { %5445 = vmatprep.mubr.msk.f32.mxu0 %vm6426_vm5, %v5712_v62  ;;  %3096 = vmatpush1.xpose.msra.mxu1 %v6467_v37  ;;  %v3887_v31 = vand.u32 4294901760, %v3886_v19  ;;  %vm5280_vm5 = vcmask 261120  }
  0xf6   : > { %3132 = vmatprep.mubr.f32.mxu1 %v2889_v47  ;;  %2852 = vmatprep.subr.mxu0 %v6449_v24  ;;  %v4319_v47 = vsub.f32 %v5417_v45, %v5417_v45 }
  0xf7   : > { %5446 = vmatmul.mubr.msk.f32.vlgmr.msra.gmra.mxu0 %vm6439_vm7, %v5712_v62  ;;  %3250 = vmatprep.subr.mxu1 %v6449_v24  ;;  %v6634_v24 = vsub.f32 %v441_v32, %v6613_v51  ;;  %vm5282_vm7 = vcmask 293888  }
  0xf8   : > { %2854 = vmatpush1.xpose.msra.mxu0 %v6467_v37  ;;  %3136 = vmatmul.mubr.f32.vlgmr.msra.gmra.mxu1 %v2895_v5  ;;  %v4320_v5 = vand.u32 4294901760, %v4319_v47 }
  0xf9   : > { %2892 = vmatprep.mubr.f32.mxu0 %v2891_v54  ;;  %3252 = vmatpush1.xpose.msra.mxu1 %v6467_v37  ;;  %v3370_v37 = vand.u32 4294901760, %v6630_v8  ;;  %v3891_v6 = vand.u32 4294901760, %v6634_v24 }
  0xfa   : > { %5453 = vmatprep.mubr.msk.f32.mxu1 %vm6507_vm15, %v5712_v62  ;;  %3017 = vmatprep.subr.mxu0 %v6480_v38  ;;  %v5416_v38 = vsel %vm7028_vm6, 1.0, %v5711_v57  ;;  %v4321_v0 = vsub.f32 %v4319_v47, %v4320_v5 }
  0xfb   : > { %2898 = vmatmul.mubr.f32.vlgmr.msra.gmra.mxu0 %v2897_v49  ;;  %3413 = vmatprep.subr.mxu1 %v3412_v7  ;;  %v3838_v30 = vsub.f32 %v5416_v38, %v5416_v38 }
  0xfc   : > { %3020 = vmatpush1.xpose.msra.mxu0 %v6488_v55  ;;  %5454 = vmatmul.mubr.msk.f32.vlgmr.msra.gmra.mxu1 %vm6520_vm1, %v5712_v62  ;;  %v3892_v55 = vsub.f32 %v6634_v24, %v3891_v6  ;;  %v4322_v20 = vand.u32 4294901760, %v4321_v0 }
  0xfd   : > { %3055 = vmatprep.mubr.f32.mxu0 %v6558_v56  ;;  %3419 = vmatpush1.xpose.msra.mxu1 %v3418_v2  ;;  %v4361_v56 = vsub.f32 %v6689_v59, %v4360_v23 }
  0xfe   : > { %5455 = vmatprep.mubr.msk.f32.mxu1 %vm7026_vm13, %v5712_v62  ;;  %3174 = vmatprep.subr.mxu0 %v2935_v12  ;;  %v3371_v12 = vsub.f32 %v6630_v8, %v3370_v37  ;;  %v3893_v17 = vand.u32 4294901760, %v3892_v55 }
  0xff   : > { %3058 = vmatmul.mubr.f32.vlgmr.msra.gmra.mxu0 %v6565_v33  ;;  %3569 = vmatprep.subr.mxu1 %v6530_v16  ;;  %v4367_v33 = vsub.f32 %v6694_v46, %v4366_v28  ;;  %v4362_v34 = vand.u32 4294901760, %v4361_v56 }
 0x100   : > { %3178 = vmatpush1.xpose.msra.mxu0 %v2941_v44  ;;  %5456 = vmatmul.mubr.msk.f32.vlgmr.msra.gmra.mxu1 %vm7027_vm4, %v5712_v62  ;;  %v3366_v44 = vand.u32 4294901760, %v3365_v40  ;;  %v3372_v11 = vand.u32 4294901760, %v3371_v12 }
 0x101   : > { %5451 = vmatprep.mubr.msk.f32.mxu0 %vm6507_vm15, %v5712_v62  ;;  %3571 = vmatpush1.xpose.msra.mxu1 %v6548_v21  ;;  %v4368_v9 = vand.u32 4294901760, %v4367_v33 }
 0x102   : > { %3607 = vmatprep.mubr.f32.mxu1 %v3364_v10  ;;  %3327 = vmatprep.subr.mxu0 %v6530_v16 }
 0x103   : > { %5452 = vmatmul.mubr.msk.f32.vlgmr.msra.gmra.mxu0 %vm6520_vm1, %v5712_v62  ;;  %3725 = vmatprep.subr.mxu1 %v6530_v16  ;;  %v3839_v16 = vand.u32 4294901760, %v3838_v30 }
 0x104   : > { %3329 = vmatpush1.xpose.msra.mxu0 %v6548_v21  ;;  %3611 = vmatmul.mubr.f32.vlgmr.msra.gmra.mxu1 %v3370_v37 }
 0x105   : > { %3367 = vmatprep.mubr.f32.mxu0 %v3366_v44  ;;  %3727 = vmatpush1.xpose.msra.mxu1 %v6548_v21  ;;  %v3845_v21 = vand.u32 4294901760, %v3844_v27  ;;  %v3840_v52 = vsub.f32 %v3838_v30, %v3839_v16 }
 0x106   : > { %5459 = vmatprep.mubr.msk.f32.mxu1 %vm7026_vm13, %v5712_v62  ;;  %3492 = vmatprep.subr.mxu0 %v6561_v29  ;;  %v5418_v29 = vsel %vm6325_vm0, 1.0, %v5711_v57 }
 0x107   : > { %3373 = vmatmul.mubr.f32.vlgmr.msra.gmra.mxu0 %v3372_v11  ;;  %3888 = vmatprep.subr.mxu1 %v3887_v31  ;;  %v3846_v32 = vsub.f32 %v3844_v27, %v3845_v21  ;;  %v3841_v35 = vand.u32 4294901760, %v3840_v52 }
 0x108   : > { %3495 = vmatpush1.xpose.msra.mxu0 %v6569_v42  ;;  %5460 = vmatmul.mubr.msk.f32.vlgmr.msra.gmra.mxu1 %vm7027_vm4, %v5712_v62  ;;  %v4313_v42 = vsub.f32 %v5418_v29, %v5418_v29 }
 0x109   : > { %3530 = vmatprep.mubr.f32.mxu0 %v6623_v3  ;;  %3894 = vmatpush1.xpose.msra.mxu1 %v3893_v17 }
 0x10a   : > { %5461 = vmatprep.mubr.msk.f32.mxu1 %vm7028_vm6, %v5712_v62  ;;  %3649 = vmatprep.subr.mxu0 %v3410_v58  ;;  %v3847_v58 = vand.u32 4294901760, %v3846_v32  ;;  %v4314_v48 = vand.u32 4294901760, %v4313_v42 }
 0x10b   : > { %3533 = vmatmul.mubr.f32.vlgmr.msra.gmra.mxu0 %v6630_v8  ;;  %4044 = vmatprep.subr.mxu1 %v6595_v15 }
 0x10c   : > { %3653 = vmatpush1.xpose.msra.mxu0 %v3416_v61  ;;  %5462 = vmatmul.mubr.msk.f32.vlgmr.msra.gmra.mxu1 %vm7029_vm10, %v5712_v62  ;;  %v4315_v61 = vsub.f32 %v4313_v42, %v4314_v48 }
 0x10d   : > { %5457 = vmatprep.mubr.msk.f32.mxu0 %vm7026_vm13, %v5712_v62  ;;  %4046 = vmatpush1.xpose.msra.mxu1 %v6613_v51 }
 0x10e   : > { %4082 = vmatprep.mubr.f32.mxu1 %v3839_v16  ;;  %3802 = vmatprep.subr.mxu0 %v6595_v15  ;;  %v4316_v1 = vand.u32 4294901760, %v4315_v61 }
 0x10f   : > { %5458 = vmatmul.mubr.msk.f32.vlgmr.msra.gmra.mxu0 %vm7027_vm4, %v5712_v62  ;;  %4200 = vmatprep.subr.mxu1 %v6595_v15 }
 0x110   : > { %3804 = vmatpush1.xpose.msra.mxu0 %v6613_v51  ;;  %4086 = vmatmul.mubr.f32.vlgmr.msra.gmra.mxu1 %v3845_v21 }
 0x111   : > { %3842 = vmatprep.mubr.f32.mxu0 %v3841_v35  ;;  %4202 = vmatpush1.xpose.msra.mxu1 %v6613_v51 }
 0x112   : > { %5465 = vmatprep.mubr.msk.f32.mxu1 %vm7028_vm6, %v5712_v62  ;;  %3967 = vmatprep.subr.mxu0 %v6626_v36 }
 0x113   : > { %3848 = vmatmul.mubr.f32.vlgmr.msra.gmra.mxu0 %v3847_v58  ;;  %4363 = vmatprep.subr.mxu1 %v4362_v34 }
 0x114   : > { %3970 = vmatpush1.xpose.msra.mxu0 %v6634_v24  ;;  %5466 = vmatmul.mubr.msk.f32.vlgmr.msra.gmra.mxu1 %vm7029_vm10, %v5712_v62 }
 0x115   : > { %4005 = vmatprep.mubr.f32.mxu0 %v3838_v30  ;;  %4369 = vmatpush1.xpose.msra.mxu1 %v4368_v9 }
 0x116   : > { %5467 = vmatprep.mubr.msk.f32.mxu1 %vm6325_vm0, %v5712_v62  ;;  %4124 = vmatprep.subr.mxu0 %v3885_v13 }
 0x117   : > { %4008 = vmatmul.mubr.f32.vlgmr.msra.gmra.mxu0 %v3844_v27  ;;  %4519 = vmatprep.subr.mxu1 %v6660_v43 }
 0x118   : > { %4128 = vmatpush1.xpose.msra.mxu0 %v3891_v6  ;;  %5468 = vmatmul.mubr.msk.f32.vlgmr.msra.gmra.mxu1 %vm7030_vm14, %v5712_v62 }
 0x119   : > { %5463 = vmatprep.mubr.msk.f32.mxu0 %vm7028_vm6, %v5712_v62  ;;  %4521 = vmatpush1.xpose.msra.mxu1 %v6678_v22 }
 0x11a   : > { %4557 = vmatprep.mubr.f32.mxu1 %v4314_v48  ;;  %4277 = vmatprep.subr.mxu0 %v6660_v43 }
 0x11b   : > { %5464 = vmatmul.mubr.msk.f32.vlgmr.msra.gmra.mxu0 %vm7029_vm10, %v5712_v62  ;;  %4675 = vmatprep.subr.mxu1 %v6660_v43 }
 0x11c   : > { %4279 = vmatpush1.xpose.msra.mxu0 %v6678_v22  ;;  %4561 = vmatmul.mubr.f32.vlgmr.msra.gmra.mxu1 %v4320_v5  ;;  %v5713_v5 = vmov 1983009808  }
 0x11d   : > { %4317 = vmatprep.mubr.f32.mxu0 %v4316_v1  ;;  %4677 = vmatpush1.xpose.msra.mxu1 %v6678_v22  ;;  %v4867_v61 = vunpack.c.l.s4 %v5713_v5 }
 0x11e   : > { %5471 = vmatprep.mubr.msk.f32.mxu1 %vm6325_vm0, %v5712_v62  ;;  %4442 = vmatprep.subr.mxu0 %v6689_v59 }
 0x11f   : > { %4323 = vmatmul.mubr.f32.vlgmr.msra.gmra.mxu0 %v4322_v20 }
 0x120   : > { %4445 = vmatpush1.xpose.msra.mxu0 %v6694_v46  ;;  %5472 = vmatmul.mubr.msk.f32.vlgmr.msra.gmra.mxu1 %vm7030_vm14, %v5712_v62 }
 0x121   : > { %4480 = vmatprep.mubr.f32.mxu0 %v4313_v42  ;;  %4599 = vmatprep.subr.mxu0 %v4360_v23  ;;  %v4813_v42 = vpop.permute.xlu0 %4812 }
 0x123   : > { %4483 = vmatmul.mubr.f32.vlgmr.msra.gmra.mxu0 %v4319_v47 }
 0x124   : > { %4603 = vmatpush1.xpose.msra.mxu0 %v4366_v28  ;;  %5469 = vmatprep.mubr.msk.f32.mxu0 %vm6325_vm0, %v5712_v62  ;;  %vm5268_vm0 = vcmask 64512  }
 0x127   : > { %5470 = vmatmul.mubr.msk.f32.vlgmr.msra.gmra.mxu0 %vm7030_vm14, %v5712_v62 }
 0x176   : > { %v606_v60 = vpop.f32.mrf.mxu1 }
 0x178   : > { %v608_v15 = vpop.f32.mrf.mxu1 }
 0x17b   : > { %v762_v39 = vpop.f32.mrf.mxu1 }
 0x17d   : > { %v764_v53 = vpop.f32.mrf.mxu1 }
 0x17e   : > { %v4818_v53 = vpop.permute.xlu1 %4817 }
 0x17f   : > { %v524_v14 = vpop.f32.mrf.mxu0  ;;  %v914_v51 = vpop.f32.mrf.mxu1 }
 0x180   : > { %v607_v30 = vadd.f32 %v606_v60, %v524_v14 }
 0x181   : > { %v526_v50 = vpop.f32.mrf.mxu0  ;;  %v916_v54 = vpop.f32.mrf.mxu1 }
 0x183   : > { %v684_v7 = vpop.f32.mrf.mxu0 }
 0x184   : > { %v1081_v3 = vpop.f32.mrf.mxu1  ;;  %v685_v17 = vadd.f32 %v684_v7, %v607_v30  ;;  %v4868_v7 = vunpack.c.0.s8 %v4867_v61 }
 0x185   : > { %v686_v36 = vpop.f32.mrf.mxu0 }
 0x186   : > { %v1083_v25 = vpop.f32.mrf.mxu1  ;;  %v763_v29 = vadd.f32 %v762_v39, %v685_v17 }
 0x187   : > { %v840_v8 = vpop.f32.mrf.mxu0  ;;  %v4823_v25 = vpop.permute.xlu0 %4822 }
 0x188   : > { %v1237_v49 = vpop.f32.mrf.mxu1  ;;  %v841_v58 = vadd.f32 %v840_v8, %v763_v29 }
 0x189   : > { %v842_v41 = vpop.f32.mrf.mxu0 }
 0x18a   : > { %v1239_v2 = vpop.f32.mrf.mxu1  ;;  %v915_v14 = vadd.f32 %v914_v51, %v841_v58 }
 0x18b   : > { %v999_v24 = vpop.f32.mrf.mxu0 }
 0x18c   : > { %v1389_v10 = vpop.f32.mrf.mxu1  ;;  %v1082_v46 = vadd.f32 %v1081_v3, %v999_v24  ;;  %v5714_v3 = vmov 1934713408  }
 0x18d   : > { %v1001_v63 = vpop.f32.mrf.mxu0  ;;  %v4931_v36 = vunpack.c.l.s4 %v5714_v3 }
 0x18e   : > { %v1391_v62 = vpop.f32.mrf.mxu1 }
 0x18f   : > { %v1159_v13 = vpop.f32.mrf.mxu0  ;;  %v4855_v62 = vmul.f32 %v4813_v42, %v915_v14  ;;  %v4932_v51 = vunpack.c.0.s8 %v4931_v36 }
 0x190   : > { %v1556_v18 = vpop.f32.mrf.mxu1  ;;  %v1160_v21 = vadd.f32 %v1159_v13, %v1082_v46 }
 0x191   : > { %v1161_v37 = vpop.f32.mrf.mxu0 }
 0x192   : > { %v1558_v6 = vpop.f32.mrf.mxu1  ;;  %v1238_v45 = vadd.f32 %v1237_v49, %v1160_v21  ;;  %v6795_v37 = vsub.s32 %v4868_v7, %v6008_v26 }
 0x193   : > { %v1315_v40 = vpop.f32.mrf.mxu0  ;;  %v4828_v6 = vpop.permute.xlu1 %4827 }
 0x194   : > { %v1712_v19 = vpop.f32.mrf.mxu1  ;;  %v1316_v1 = vadd.f32 %v1315_v40, %v1238_v45 }
 0x195   : > { %v1317_v43 = vpop.f32.mrf.mxu0 }
 0x196   : > { %v1714_v38 = vpop.f32.mrf.mxu1  ;;  %v1390_v49 = vadd.f32 %v1389_v10, %v1316_v1 }
 0x197   : > { %v1474_v12 = vpop.f32.mrf.mxu0 }
 0x198   : > { %v1864_v55 = vpop.f32.mrf.mxu1  ;;  %v1557_v4 = vadd.f32 %v1556_v18, %v1474_v12 }
 0x199   : > { %v1476_v22 = vpop.f32.mrf.mxu0 }
 0x19a   : > { %v1866_v44 = vpop.f32.mrf.mxu1 }
 0x19b   : > { %v1634_v31 = vpop.f32.mrf.mxu0 }
 0x19c   : > { %v1635_v59 = vadd.f32 %v1634_v31, %v1557_v4  ;;  %v2031_v27 = vpop.f32.mrf.mxu1  ;;  %v6802_v31 = vsub.s32 %v4932_v51, %v6008_v26 }
 0x19d   : > { %v1636_v11 = vpop.f32.mrf.mxu0 }
 0x19e   : > { %v2033_v16 = vpop.f32.mrf.mxu1  ;;  %v1713_v28 = vadd.f32 %v1712_v19, %v1635_v59  ;;  %v4856_v19 = vmul.f32 %v4818_v53, %v1390_v49 }
 0x19f   : > { %v1790_v23 = vpop.f32.mrf.mxu0 }
 0x1a0   : > { %v2187_v52 = vpop.f32.mrf.mxu1  ;;  %v1791_v35 = vadd.f32 %v1790_v23, %v1713_v28 }
 0x1a1   : > { %v1792_v56 = vpop.f32.mrf.mxu0 }
 0x1a2   : > { %v2189_v32 = vpop.f32.mrf.mxu1  ;;  %v1865_v20 = vadd.f32 %v1864_v55, %v1791_v35 }
 0x1a3   : > { %v1949_v33 = vpop.f32.mrf.mxu0 }
 0x1a4   : > { %v2339_v34 = vpop.f32.mrf.mxu1  ;;  %v2032_v9 = vadd.f32 %v2031_v27, %v1949_v33  ;;  %v4857_v41 = vmul.f32 %v4823_v25, %v1865_v20 }
 0x1a5   : > { %v1951_v47 = vpop.f32.mrf.mxu0 }
 0x1a6   : > { %v2341_v48 = vpop.f32.mrf.mxu1  ;;  %v4864_v43 = vcombine.low %v4855_v62, %v4857_v41  ;;  %v4865_v38 = vcombine.high %v4855_v62, %v4857_v41 }
 0x1a7   : > { %v2109_v0 = vpop.f32.mrf.mxu0 }
 0x1a8   : > { %v2110_v60 = vadd.f32 %v2109_v0, %v2032_v9  ;;  %v6790_v15 = vpop.f32.mrf.mxu1  ;;  %v4872_v59 = vrot.slane %v4864_v43, %v6795_v37  ;;  %v4879_v27 = vrot.slane %v4865_v38, %v6795_v37 }
 0x1a9   : > { %v2111_v39 = vpop.f32.mrf.mxu0 }
 0x1aa   : > { %v2508_v50 = vpop.f32.mrf.mxu1  ;;  %v2188_v54 = vadd.f32 %v2187_v52, %v2110_v60 }
 0x1ab   : > { %v2265_v8 = vpop.f32.mrf.mxu0 }
 0x1ac   : > { %v2266_v2 = vadd.f32 %v2265_v8, %v2188_v54  ;;  %v6792_v24 = vpop.f32.mrf.mxu1 }
 0x1ad   : > { %v2267_v63 = vpop.f32.mrf.mxu0 }
 0x1ae   : > { %v2340_v13 = vadd.f32 %v2339_v34, %v2266_v2  ;;  %v2664_v18 = vpop.f32.mrf.mxu1 }
 0x1af   : > { %v6797_v40 = vpop.f32.mrf.mxu0 }
 0x1b0   : > { %v4858_v12 = vmul.f32 %v4828_v6, %v2340_v13  ;;  %v6799_v10 = vpop.f32.mrf.mxu1 }
 0x1b1   : > { %v2426_v55 = vpop.f32.mrf.mxu0 }
 0x1b2   : > { %v4880_v22 = vcombine.low %v4856_v19, %v4858_v12  ;;  %v4881_v4 = vcombine.high %v4856_v19, %v4858_v12  ;;  %v2816_v44 = vpop.f32.mrf.mxu1 }
 0x1b3   : > { %v6804_v30 = vpop.f32.mrf.mxu0 }
 0x1b4   : > { %v4888_v11 = vrot.slane %v4880_v22, %v6795_v37  ;;  %v4895_v17 = vrot.slane %v4881_v4, %v6795_v37  ;;  %v6810_v46 = vpop.f32.mrf.mxu1 }
 0x1b5   : > { %v2586_v16 = vpop.f32.mrf.mxu0 }
 0x1b6   : > { %v4928_v23 = vcombine.low %v4872_v59, %v4888_v11  ;;  %v4929_v21 = vcombine.high %v4872_v59, %v4888_v11  ;;  %v4944_v28 = vcombine.low %v4879_v27, %v4895_v17  ;;  %v4945_v52 = vcombine.high %v4879_v27, %v4895_v17  ;;  %v2983_v56 = vpop.f32.mrf.mxu1 }
 0x1b7   : > { %v6812_v26 = vpop.f32.mrf.mxu0  ;;  %v2507_v59 = vadd.f32 %v6790_v15, %v6797_v40  ;;  %v4833_v15 = vpop.permute.xlu0 %4832 }
 0x1b8   : > { %v4936_v29 = vrot.slane %v4928_v23, %v6802_v31  ;;  %v4943_v32 = vrot.slane %v4929_v21, %v6802_v31  ;;  %v4952_v33 = vrot.slane %v4944_v28, %v6802_v31  ;;  %v4959_v45 = vrot.slane %v4945_v52, %v6802_v31  ;;  %v6818_v35 = vpop.f32.mrf.mxu1 }
 0x1b9   : > { %v2742_v34 = vpop.f32.mrf.mxu0  ;;  %v2585_v16 = vadd.f32 %v6804_v30, %v2507_v59 }
 0x1ba   : > { %v3139_v42 = vpop.f32.mrf.mxu1  ;;  %v5474_v47 = vcombine.low %v4936_v29, %v4943_v32  ;;  %v5476_v58 = vcombine.high %v4936_v29, %v4943_v32  ;;  %v5478_v9 = vcombine.low %v4952_v33, %v4959_v45  ;;  %v5480_v48 = vcombine.high %v4952_v33, %v4959_v45 }
 0x1bb   : > { %v2899_v5 = vpop.f32.mrf.mxu0  ;;  %v2663_v33 = vadd.f32 %v6792_v24, %v2585_v16 }
 0x1bc   : > { %v6820_v61 = vpop.f32.mrf.mxu1  ;;  %v5057_v0 = vrot.slane %v5474_v47, %v6795_v37  ;;  %v5073_v1 = vrot.slane %v5476_v58, %v6795_v37  ;;  %v5089_v20 = vrot.slane %v5478_v9, %v6795_v37  ;;  %v5105_v53 = vrot.slane %v5480_v48, %v6795_v37 }
 0x1bd   : > { %v2901_v60 = vpop.f32.mrf.mxu0  ;;  %v2982_v21 = vadd.f32 %v6810_v46, %v2899_v5  ;;  %v2741_v30 = vadd.f32 %v6812_v26, %v2663_v33 }
 0x1be   : > { %v3291_v39 = vpop.f32.mrf.mxu1  ;;  %v5114_v14 = vcombine.high %v5057_v0, %v5073_v1  ;;  %v5113_v50 = vcombine.low %v5057_v0, %v5073_v1  ;;  %v5146_v7 = vcombine.high %v5089_v20, %v5105_v53  ;;  %v5145_v3 = vcombine.low %v5089_v20, %v5105_v53  ;;  %v4838_v53 = vpop.permute.xlu1 %4837 }
 0x1bf   : > { %v3059_v54 = vpop.f32.mrf.mxu0  ;;  %v2815_v24 = vadd.f32 %v6799_v10, %v2741_v30 }
 0x1c0   : > { %v3456_v36 = vpop.f32.mrf.mxu1  ;;  %v5128_v25 = vrot.slane %v5114_v14, %v6802_v31  ;;  %v6828_v8 = vrot.slane %v5113_v50, %v6802_v31  ;;  %v5160_v41 = vrot.slane %v5146_v7, %v6802_v31  ;;  %v6832_v2 = vrot.slane %v5145_v3, %v6802_v31  ;;  %v4843_v14 = vpop.permute.xlu0 %4842 }
 0x1c1   : > { %v3061_v49 = vpop.f32.mrf.mxu0  ;;  %v3060_v29 = vadd.f32 %v3059_v54, %v2982_v21 }
 0x1c2   : > { %v3458_v63 = vpop.f32.mrf.mxu1  ;;  %v5179_v13 = vcombine.low %v5128_v25, %v5160_v41  ;;  %v5178_v18 = vcombine.high %v6828_v8, %v6832_v2  ;;  %v5177_v51 = vcombine.low %v6828_v8, %v6832_v2  ;;  %v5180_v12 = vcombine.high %v5128_v25, %v5160_v41 }
 0x1c3   : > { %v3215_v62 = vpop.f32.mrf.mxu0  ;;  %v3138_v40 = vadd.f32 %v6818_v35, %v3060_v29  ;;  %v4859_v25 = vmul.f32 %v4833_v15, %v2815_v24 }
 0x1c4   : > { %v3612_v6 = vpop.f32.mrf.mxu1  ;;  %5239 = vrot.lane.b32.xlu0 %v5179_v13, %s5715_s5  ;;  %5235 = vrot.lane.b32.xlu1 %v5178_v18, %s5716_s6  ;;  %s5625_s5 = scalar_lea.vmem %s5300_s22, 128  ;;  %s5629_s6 = sshll.u32 %s5723_s15, 4  ;;  %s5630_s6 = int_to_ptr.vmem [resolvable:$false] %s5629_s6 }
 0x1c5   : > { %v3217_v19 = vpop.f32.mrf.mxu0  ;;  %v3216_v1 = vadd.f32 %v3215_v62, %v3138_v40  ;;  %v4848_v62 = vpop.permute.xlu1 %4847  ;;  %p5626_p8 = scmp.ne.s32.totalorder %s5300_s22, %s5625_s5  ;;  %p5632_p1 = scmp.lt.s32.totalorder %s5300_s22, %s5630_s6 }
 0x1c6   : > { %v3614_v43 = vpop.f32.mrf.mxu1 }
 0x1c7   : > { %v3374_v38 = vpop.f32.mrf.mxu0  ;;  %v3290_v3 = vadd.f32 %v6820_v61, %v3216_v1  ;;  %p5627_p12 = pnand %p5626_p8, %p5795_p9 }
 0x1c8   : > { %v3764_v55 = vpop.f32.mrf.mxu1  ;;  %5243 = vrot.lane.b32.xlu1 %v5180_v12, %s5717_s7  ;;  %v3457_v4 = vadd.f32 %v3456_v36, %v3374_v38  ;;  %s5631_s7 = scalar_lea.vmem %s5630_s6, 256 }
 0x1c9   : > { %v3376_v22 = vpop.f32.mrf.mxu0  ;;  %p5628_p0 = pneg %p5627_p12  ;;  %p5633_p3 = scmp.lt.s32.totalorder %s5631_s7, %s5625_s5 }
 0x1ca   : > { %v3766_v44 = vpop.f32.mrf.mxu1 }
 0x1cb   : > { %v3534_v27 = vpop.f32.mrf.mxu0  ;;  %p5634_p5 = por %p5633_p3, %p5632_p1 }
 0x1cc   : > { %v3535_v11 = vadd.f32 %v3534_v27, %v3457_v4  ;;  %v3931_v17 = vpop.f32.mrf.mxu1 }
 0x1cd   : > { %v3536_v23 = vpop.f32.mrf.mxu0  ;;  %p5635_p6 = pnand %p5634_p5, %p5628_p0 }
 0x1ce   : > { %v3933_v28 = vpop.f32.mrf.mxu1  ;;  %v3613_v52 = vadd.f32 %v3612_v6, %v3535_v11  ;;  %v4860_v6 = vmul.f32 %v4838_v53, %v3290_v3 }
 0x1cf   : > { %v3690_v56 = vpop.f32.mrf.mxu0 }
 0x1d0   : > { %v4087_v32 = vpop.f32.mrf.mxu1  ;;  %v3691_v42 = vadd.f32 %v3690_v56, %v3613_v52 }
 0x1d1   : > { %v3692_v45 = vpop.f32.mrf.mxu0 }
 0x1d2   : > { %v4089_v34 = vpop.f32.mrf.mxu1  ;;  %v3765_v5 = vadd.f32 %v3764_v55, %v3691_v42 }
 0x1d3   : > { %v3849_v47 = vpop.f32.mrf.mxu0 }
 0x1d4   : > { %v4239_v58 = vpop.f32.mrf.mxu1  ;;  %v3932_v48 = vadd.f32 %v3931_v17, %v3849_v47  ;;  %v4861_v7 = vmul.f32 %v4843_v14, %v3765_v5 }
 0x1d5   : > { %v3851_v9 = vpop.f32.mrf.mxu0 }
 0x1d6   : > { %v4241_v46 = vpop.f32.mrf.mxu1  ;;  %v4896_v13 = vcombine.low %v4859_v25, %v4861_v7  ;;  %v4897_v19 = vcombine.high %v4859_v25, %v4861_v7 }
 0x1d7   : > { %v4009_v0 = vpop.f32.mrf.mxu0 }
 0x1d8   : > { %v4010_v20 = vadd.f32 %v4009_v0, %v3932_v48  ;;  %v4406_v60 = vpop.f32.mrf.mxu1  ;;  %v4904_v61 = vrot.slane %v4896_v13, %v6795_v37  ;;  %v4911_v59 = vrot.slane %v4897_v19, %v6795_v37  ;;  %v4853_v48 = vpop.permute.xlu0 %4852 }
 0x1d9   : > { %v4011_v39 = vpop.f32.mrf.mxu0 }
 0x1da   : > { %v4408_v50 = vpop.f32.mrf.mxu1  ;;  %v4088_v54 = vadd.f32 %v4087_v32, %v4010_v20 }
 0x1db   : > { %v4165_v35 = vpop.f32.mrf.mxu0 }
 0x1dc   : > { %v4166_v26 = vadd.f32 %v4165_v35, %v4088_v54  ;;  %v4562_v36 = vpop.f32.mrf.mxu1 }
 0x1dd   : > { %v4167_v49 = vpop.f32.mrf.mxu0 }
 0x1de   : > { %v4240_v41 = vadd.f32 %v4239_v58, %v4166_v26  ;;  %v4564_v63 = vpop.f32.mrf.mxu1 }
 0x1df   : > { %v4324_v18 = vpop.f32.mrf.mxu0 }
 0x1e0   : > { %v4862_v10 = vmul.f32 %v4848_v62, %v4240_v41  ;;  %v4714_v43 = vpop.f32.mrf.mxu1  ;;  %v4407_v22 = vadd.f32 %v4406_v60, %v4324_v18 }
 0x1e1   : > { %v4326_v38 = vpop.f32.mrf.mxu0 }
 0x1e2   : > { %v4912_v12 = vcombine.low %v4860_v6, %v4862_v10  ;;  %v4913_v55 = vcombine.high %v4860_v6, %v4862_v10  ;;  %v4716_v4 = vpop.f32.mrf.mxu1 }
 0x1e3   : > { %v4484_v44 = vpop.f32.mrf.mxu0 }
 0x1e4   : > { %v4920_v27 = vrot.slane %v4912_v12, %v6795_v37  ;;  %v4927_v11 = vrot.slane %v4913_v55, %v6795_v37  ;;  %v4485_v17 = vadd.f32 %v4484_v44, %v4407_v22 }
 0x1e5   : > { %v4486_v16 = vpop.f32.mrf.mxu0 }
 0x1e6   : > { %v4960_v23 = vcombine.low %v4904_v61, %v4920_v27  ;;  %v4961_v21 = vcombine.high %v4904_v61, %v4920_v27  ;;  %v4976_v28 = vcombine.low %v4911_v59, %v4927_v11  ;;  %v4977_v52 = vcombine.high %v4911_v59, %v4927_v11 }
 0x1e7   : > { %v4563_v56 = vadd.f32 %v4562_v36, %v4485_v17  ;;  %v4640_v29 = vpop.f32.mrf.mxu0 }
 0x1e8   : > { %v4968_v32 = vrot.slane %v4960_v23, %v6802_v31  ;;  %v4975_v33 = vrot.slane %v4961_v21, %v6802_v31  ;;  %v4984_v45 = vrot.slane %v4976_v28, %v6802_v31  ;;  %v4991_v34 = vrot.slane %v4977_v52, %v6802_v31 }
 0x1e9   : > { %v4641_v42 = vadd.f32 %v4640_v29, %v4563_v56  ;;  %v4642_v47 = vpop.f32.mrf.mxu0 }
 0x1ea   : > { %v5475_v15 = vcombine.low %v4968_v32, %v4975_v33  ;;  %v5477_v40 = vcombine.high %v4968_v32, %v4975_v33  ;;  %v5479_v58 = vcombine.low %v4984_v45, %v4991_v34  ;;  %v5481_v30 = vcombine.high %v4984_v45, %v4991_v34 }
 0x1eb   : > { %v4715_v9 = vadd.f32 %v4714_v43, %v4641_v42 }
 0x1ec   : > { %v5064_v46 = vrot.slane %v5475_v15, %v6795_v37  ;;  %v5080_v5 = vrot.slane %v5477_v40, %v6795_v37  ;;  %v5096_v0 = vrot.slane %v5479_v58, %v6795_v37  ;;  %v5112_v1 = vrot.slane %v5481_v30, %v6795_v37 }
 0x1ed   : > { %v4863_v20 = vmul.f32 %v4853_v48, %v4715_v9 }
 0x1ee   : > { %v5129_v60 = vcombine.low %v5064_v46, %v5080_v5  ;;  %v5161_v53 = vcombine.low %v5096_v0, %v5112_v1  ;;  %v5130_v24 = vcombine.high %v5064_v46, %v5080_v5  ;;  %v5162_v39 = vcombine.high %v5096_v0, %v5112_v1 }
 0x1ef   : > { %v5000_v14 = vcombine.high %v4863_v20, %v5711_v57  ;;  %v5007_v50 = vrot.slane %v4863_v20, %v6795_v37 }
 0x1f0   : > { %v5137_v54 = vrot.slane %v5129_v60, %v6802_v31  ;;  %v5169_v7 = vrot.slane %v5161_v53, %v6802_v31  ;;  %v5144_v25 = vrot.slane %v5130_v24, %v6802_v31  ;;  %v5176_v49 = vrot.slane %v5162_v39, %v6802_v31 }
 0x1f1   : > { %v5014_v35 = vrot.slane %v5000_v14, %v6795_v37  ;;  %v5015_v3 = vcombine.high %v5007_v50, %v5711_v57  ;;  %v5022_v41 = vrot.slane %v5007_v50, %v6802_v31 }
 0x1f2   : > { %v5182_v26 = vcombine.high %v5137_v54, %v5169_v7  ;;  %v5181_v36 = vcombine.low %v5137_v54, %v5169_v7  ;;  %v5184_v10 = vcombine.high %v5144_v25, %v5176_v49  ;;  %v5183_v43 = vcombine.low %v5144_v25, %v5176_v49 }
 0x1f3   : > { %v5029_v63 = vrot.slane %v5015_v3, %v6802_v31  ;;  %v5030_v62 = vcombine.high %v5014_v35, %v5711_v57  ;;  %v5037_v13 = vrot.slane %v5014_v35, %v6802_v31 }
 0x1f4   : > { %5251 = vrot.lane.b32.xlu1 %v5182_v26, %s5718_s8  ;;  %5247 = vrot.lane.b32.xlu0 %v5181_v36, %s5719_s9 }
 0x1f5   : > { %v5044_v18 = vrot.slane %v5030_v62, %v6802_v31  ;;  %v5185_v6 = vcombine.low %v5022_v41, %v5029_v63  ;;  %v5482_v19 = vcombine.high %v5022_v41, %v5029_v63 }
 0x1f7   : > { %v5192_v38 = vrot.slane %v5185_v6, %v6795_v37  ;;  %v5200_v12 = vrot.slane %v5482_v19, %v6795_v37  ;;  %v5201_v55 = vcombine.low %v5037_v13, %v5044_v18  ;;  %v5483_v22 = vcombine.high %v5037_v13, %v5044_v18 }
 0x1f8   : > { %5259 = vrot.lane.b32.xlu1 %v5184_v10, %s5720_s10  ;;  %5255 = vrot.lane.b32.xlu0 %v5183_v43, %s5721_s11 }
 0x1f9   : > { %v5208_v57 = vrot.slane %v5201_v55, %v6795_v37  ;;  %v5216_v4 = vrot.slane %v5483_v22, %v6795_v37  ;;  %v5217_v61 = vcombine.low %v5192_v38, %v5200_v12 }
 0x1fb   : > { %v5225_v44 = vcombine.low %v5208_v57, %v5216_v4  ;;  %v5224_v59 = vrot.slane %v5217_v61, %v6802_v31 }
 0x1fd   : > { %v5232_v27 = vrot.slane %v5225_v44, %v6802_v31 }
 0x1ff   : > { %v5233_v11 = vcombine.low %v5224_v59, %v5232_v27 }
 0x201   : > { %5263 = vrot.lane.b32.xlu0 %v5233_v11, %s5722_s24 }
 0x236   : > { %v5236_v17 = vpop.permute.xlu1 %5235  ;;  %v5240_v16 = vpop.permute.xlu0 %5239 }
 0x237   : > { %v5267_v21 = vsel %vm5266_vm12, %v5177_v51, %v5236_v17 }
 0x238   : > { %v5269_v28 = vsel %vm5268_vm0, %v5267_v21, %v5240_v16 }
 0x23a   : > { %v5244_v23 = vpop.permute.xlu1 %5243 }
 0x23b   : > { %v5271_v31 = vsel %vm5270_vm3, %v5269_v28, %v5244_v23 }
 0x266   : > { %v5248_v37 = vpop.permute.xlu0 %5247  ;;  %v5252_v52 = vpop.permute.xlu1 %5251 }
 0x267   : > { %v5273_v56 = vsel %vm5272_vm8, %v5271_v31, %v5248_v37 }
 0x268   : > { %v5275_v32 = vsel %vm5274_vm9, %v5273_v56, %v5252_v52 }
 0x26a   : > { %v5256_v29 = vpop.permute.xlu0 %5255  ;;  %v5260_v33 = vpop.permute.xlu1 %5259 }
 0x26b   : > { %v5277_v45 = vsel %vm5276_vm2, %v5275_v32, %v5256_v29 }
 0x26c   : > { %v5279_v8 = vsel %vm5278_vm11, %v5277_v45, %v5260_v33 }
 0x273   : > { %v5264_v2 = vpop.permute.xlu0 %5263 }
 0x274   : > { %v5281_v51 = vsel %vm5280_vm5, %v5279_v8, %v5264_v2 }
 0x275   : > { %5283 = vst.msk [vmem:[%s217_s21] sm:$0xff] %vm5282_vm7, %v5281_v51 }
 0x276   : > { %5638 = shalt.err (!%p5635_p6)
}
 0x277   : > { %s5639_s8 = scalar_lea.hbm %s6886_s30, 128  ;;  %s5643_s10 = scalar_lea.hbm %s6931_s3, 256 }
 0x278   : > { %p5640_p4 = scmp.ne.s32.totalorder %s6886_s30, %s5639_s8  ;;  %p5644_p13 = scmp.lt.s32.totalorder %s6886_s30, %s6931_s3 }
 0x279   : > { %p5645_p2 = scmp.lt.s32.totalorder %s5643_s10, %s5639_s8 }
 0x27a   : > { %p5641_p7 = pnand %p5640_p4, %p5795_p9 }
 0x27b   : > { %p5646_p8 = por %p5645_p2, %p5644_p13 }
 0x27c   : > { %p5642_p10 = pneg %p5641_p7 }
 0x27e   : > { %p5647_p12 = pnand %p5646_p8, %p5642_p10 }
 0x280   : > { %5650 = shalt.err (!%p5647_p12)
}
 0x281   : > { %5493 = dma.vmem_to_hbm [thread:$0]  (%p5795_p9), %s5300_s22, 128, %s6886_s30, %s5285_s4  }
 0x282 PF: > { %s5311_s18 = sand.u32 1, %s5685_s12   ;;  %p7031_p0 = scmp.ge.s32.totalorder %s5705_s17, 2 }
 0x283   : > { %s5312_s19 = scalar_lea.sflag [#allocation4], %s5311_s18 }
 0x284   : > { %p5500_p1 = pnand %p7031_p0, %p5802_p11 }
 0x286   : > { %p5501_p3 = pneg %p5500_p1 }
 0x288   : > { %5680 = dma.done.wait (%p5501_p3), %s5312_s19, 128  }
 0x289   : > { %5682 = vsyncadd (%p5501_p3), %s5312_s19, 4294967168  ;;  %s19_s17 = sadd.s32 1, %s5705_s17   ;;  %s7032_s12 = smov %s5689_s13 }
 0x28a   : > { %p16_p5 = scmp.ge.s32.totalorder %s19_s17, 4   ;;  %s7033_s13 = smov %s5693_s14 }
 0x28b   : > { %s7034_s14 = smov %s5800_s26  ;;  %s7035_s15 = smov %s5701_s16 }
 0x28c   : > { %s7036_s16 = smov %s7038_s20  ;;  %18 = sbr.rel (!%p16_p5) target bundleno = 6 (0x6), region = 80 }
 0x291   :  { %5317 = vsyncpa [#allocation3], 1 }
 0x292   :  { %5319 = vsyncpa [#allocation3 + $0x1], 1 }
 0x293   :  { %5320 = vsyncpa [#allocation4], 1 }
 0x294   :  { %5322 = vsyncpa [#allocation4 + $0x1], 1 }

</bundles_post_ra>
